<compile_context>
chip_gen: v6e
topology: v6e:2x2x1
jax: 0.10.0
libtpu: 0.0.40
codegen_flags: <defaults>
</compile_context>

<pallas_src>
import jax
import jax.numpy as jnp
import numpy as np
from jax.experimental import pallas as pl
from jax.experimental.pallas import tpu as pltpu


# ----------------------------- Pallas kernel ------------------------------ #
def _make_encoder_kernel(T, B, E, H, V, n_layers):
    """Builds the fused encoder kernel (embedding + n_layers LSTM, unrolled in time)."""

    def kernel(*refs):
        ids_ref = refs[0]                       # (T*B, 1) int32   (row = t*B + b)
        emb_ref = refs[1]                       # (V, E)   f32
        w_refs = refs[2:2 + 3 * n_layers]       # per layer: W_ih^T (D_in,4H), W_hh^T (H,4H), b (1,4H)
        hid_ref = refs[2 + 3 * n_layers]        # (n_layers, B, H)
        cell_ref = refs[3 + 3 * n_layers]       # (n_layers, B, H)
        seq_scr = refs[4 + 3 * n_layers]        # (T*B, H) VMEM scratch: inter-layer activations

        # ---- Embedding gather as a one-hot matmul (vectorised, stays in VMEM) ----
        ids = ids_ref[...]                                              # (T*B, 1)
        vocab = jax.lax.broadcasted_iota(jnp.int32, (T * B, V), 1)      # (T*B, V)
        onehot = (ids == vocab).astype(jnp.float32)                     # (T*B, V)
        x_all = jnp.dot(onehot, emb_ref[...],
                        preferred_element_type=jnp.float32)             # (T*B, E)
        # Dropout is identity in eval mode.

        for l in range(n_layers):
            wx = w_refs[3 * l][...]             # (D_in, 4H)
            wh = w_refs[3 * l + 1][...]         # (H, 4H)
            b = w_refs[3 * l + 2][...]          # (1, 4H)
            if l > 0:
                x_all = seq_scr[...]            # previous layer's hidden sequence (T*B, H)

            # Batched input projection for all T timesteps at once; bias broadcast is
            # folded in here (single broadcast, hoisted out of the time recurrence).
            xg_all = (jnp.dot(x_all, wx, preferred_element_type=jnp.float32)
                      + jnp.broadcast_to(b, (T * B, 4 * H)))            # (T*B, 4H)

            h = jnp.zeros((B, H), jnp.float32)
            c = jnp.zeros((B, H), jnp.float32)
            for t in range(T):                  # fully unrolled: T is static
                gates = (xg_all[t * B:(t + 1) * B, :]
                         + jnp.dot(h, wh, preferred_element_type=jnp.float32))
                i = jax.nn.sigmoid(gates[:, 0 * H:1 * H])
                f = jax.nn.sigmoid(gates[:, 1 * H:2 * H])
                g = jnp.tanh(gates[:, 2 * H:3 * H])
                o = jax.nn.sigmoid(gates[:, 3 * H:4 * H])
                c = f * c + i * g
                h = o * jnp.tanh(c)
                if l < n_layers - 1:
                    # feed next layer via VMEM scratch (no HBM round-trip)
                    seq_scr[t * B:(t + 1) * B, :] = h

            hid_ref[l] = h                      # final hidden state of layer l
            cell_ref[l] = c                     # final cell state of layer l

    return kernel


def encoder_forward(src, params, hid_dim):
    """src: [T, B] int32 -> (hidden [n_layers, B, H], cell [n_layers, B, H])."""
    T, B = src.shape
    emb = params["embedding"]
    V, E = emb.shape
    layers = params["lstm"]
    n_layers = len(layers)

    ids = src.astype(jnp.int32).reshape(T * B, 1)        # time-major flatten
    flat_wb = []
    for layer in layers:
        flat_wb += [layer["wih_t"], layer["whh_t"], layer["b"]]

    kernel = _make_encoder_kernel(T, B, E, hid_dim, V, n_layers)
    n_inputs = 2 + 3 * n_layers
    hidden, cell = pl.pallas_call(
        kernel,
        out_shape=(
            jax.ShapeDtypeStruct((n_layers, B, hid_dim), jnp.float32),
            jax.ShapeDtypeStruct((n_layers, B, hid_dim), jnp.float32),
        ),
        # whole arrays resident in VMEM, single kernel invocation (no grid)
        in_specs=[pl.BlockSpec(memory_space=pltpu.MemorySpace.VMEM)] * n_inputs,
        out_specs=(pl.BlockSpec(memory_space=pltpu.MemorySpace.VMEM),
                   pl.BlockSpec(memory_space=pltpu.MemorySpace.VMEM)),
        scratch_shapes=[pltpu.VMEM((T * B, hid_dim), jnp.float32)],
    )(ids, emb, *flat_wb)
    return hidden, cell


# ------------------------------ Encoder glue ------------------------------ #
def init_encoder_params(key, input_dim, emb_dim, hid_dim, n_layers):
    """Deterministic init mirroring PyTorch shapes (Embedding + nn.LSTM)."""
    keys = jax.random.split(key, 1 + 4 * n_layers)
    params = {"embedding": jax.random.normal(keys[0], (input_dim, emb_dim),
                                             jnp.float32)}
    bound = 1.0 / np.sqrt(hid_dim)
    layers = []
    for l in range(n_layers):
        d_in = emb_dim if l == 0 else hid_dim
        k = keys[1 + 4 * l: 1 + 4 * (l + 1)]
        w_ih = jax.random.uniform(k[0], (4 * hid_dim, d_in), jnp.float32,
                                  -bound, bound)
        w_hh = jax.random.uniform(k[1], (4 * hid_dim, hid_dim), jnp.float32,
                                  -bound, bound)
        b_ih = jax.random.uniform(k[2], (4 * hid_dim,), jnp.float32, -bound, bound)
        b_hh = jax.random.uniform(k[3], (4 * hid_dim,), jnp.float32, -bound, bound)
        layers.append({
            "wih_t": w_ih.T,                                 # (D_in, 4H), gate order i,f,g,o
            "whh_t": w_hh.T,                                 # (H, 4H)
            "b": (b_ih + b_hh).reshape(1, 4 * hid_dim),      # (1, 4H)
        })
    params["lstm"] = layers
    return params


# ---------------------------- Pure-JAX reference --------------------------- #
def _reference_forward(src, params, hid_dim):
    x = jnp.take(params["embedding"], src, axis=0)       # (T, B, E)
    hiddens, cells = [], []
    for layer in params["lstm"]:
        B = x.shape[1]
        h0 = jnp.zeros((B, hid_dim), jnp.float32)
        c0 = jnp.zeros((B, hid_dim), jnp.float32)

        def step(carry, x_t, layer=layer):
            h, c = carry
            gates = (jnp.dot(x_t, layer["wih_t"], precision=jax.lax.Precision.HIGHEST)
                     + jnp.dot(h, layer["whh_t"], precision=jax.lax.Precision.HIGHEST)
                     + layer["b"][0])
            H = hid_dim
            i = jax.nn.sigmoid(gates[:, 0 * H:1 * H])
            f = jax.nn.sigmoid(gates[:, 1 * H:2 * H])
            g = jnp.tanh(gates[:, 2 * H:3 * H])
            o = jax.nn.sigmoid(gates[:, 3 * H:4 * H])
            c = f * c + i * g
            h = o * jnp.tanh(c)
            return (h, c), h

        (h_T, c_T), outs = jax.lax.scan(step, (h0, c0), x)
        hiddens.append(h_T)
        cells.append(c_T)
        x = outs
    return jnp.stack(hiddens, 0), jnp.stack(cells, 0)


# ---------------------------------- main ----------------------------------- #
if __name__ == "__main__":
    INPUT_DIM = 50     # vocab size
    EMB_DIM = 16
    HID_DIM = 32
    N_LAYERS = 2
    SEQ_LEN = 8
    BATCH = 2

    key = jax.random.PRNGKey(0)
    k_src, k_params = jax.random.split(key)
    src = jax.random.randint(k_src, (SEQ_LEN, BATCH), 0, INPUT_DIM, jnp.int32)
    params = init_encoder_params(k_params, INPUT_DIM, EMB_DIM, HID_DIM, N_LAYERS)

    hidden, cell = encoder_forward(src, params, HID_DIM)
    hidden, cell = jax.block_until_ready((hidden, cell))

    assert hidden.shape == (N_LAYERS, BATCH, HID_DIM)
    assert cell.shape == (N_LAYERS, BATCH, HID_DIM)

    # sanity-check against a pure-JAX LSTM reference (tightened tolerance, all-f32 path)
    h_ref, c_ref = _reference_forward(src, params, HID_DIM)
    np.testing.assert_allclose(np.asarray(hidden), np.asarray(h_ref),
                               rtol=1e-4, atol=1e-5)
    np.testing.assert_allclose(np.asarray(cell), np.asarray(c_ref),
                               rtol=1e-4, atol=1e-5)

    print("KERNEL_OK")
</pallas_src>

<mosaic_0001>
module attributes {stable_mosaic.version = 11 : i64} {
  func.func @kernel(%arg0: memref<16x1xi32, #tpu.memory_space<vmem>>, %arg1: memref<50x16xf32, #tpu.memory_space<vmem>>, %arg2: memref<16x128xf32, #tpu.memory_space<vmem>>, %arg3: memref<32x128xf32, #tpu.memory_space<vmem>>, %arg4: memref<1x128xf32, #tpu.memory_space<vmem>>, %arg5: memref<32x128xf32, #tpu.memory_space<vmem>>, %arg6: memref<32x128xf32, #tpu.memory_space<vmem>>, %arg7: memref<1x128xf32, #tpu.memory_space<vmem>>, %arg8: memref<2x2x32xf32, #tpu.memory_space<vmem>>, %arg9: memref<2x2x32xf32, #tpu.memory_space<vmem>>, %arg10: memref<16x32xf32, #tpu.memory_space<vmem>>) attributes {dimension_semantics = [], scalar_prefetch = 0 : i64, scratch_operands = 1 : i64, tpu.core_type = #tpu.core_type<tc>} {
    %c0 = arith.constant 0 : index
    %c0_0 = arith.constant 0 : index
    %0 = vector.load %arg0[%c0, %c0_0] : memref<16x1xi32, #tpu.memory_space<vmem>>, vector<16x1xi32>
    %1 = tpu.iota {dimensions = array<i32: 1>} : vector<16x50xi32>
    %2 = vector.broadcast %0 : vector<16x1xi32> to vector<16x50xi32>
    %3 = arith.cmpi eq, %2, %1 : vector<16x50xi32>
    %4 = arith.extui %3 : vector<16x50xi1> to vector<16x50xi32>
    %5 = arith.sitofp %4 : vector<16x50xi32> to vector<16x50xf32>
    %c0_1 = arith.constant 0 : index
    %c0_2 = arith.constant 0 : index
    %6 = vector.load %arg1[%c0_1, %c0_2] : memref<50x16xf32, #tpu.memory_space<vmem>>, vector<50x16xf32>
    %cst = arith.constant dense<0.000000e+00> : vector<16x16xf32>
    %7 = tpu.matmul %5, %6, %cst {dimension_numbers = #tpu.dot_dimension_numbers<[1], [0], [0], [1], [0, 0, 1, 1], [], []>} : vector<16x50xf32>, vector<50x16xf32>, vector<16x16xf32> -> vector<16x16xf32>
    %c0_3 = arith.constant 0 : index
    %c0_4 = arith.constant 0 : index
    %8 = vector.load %arg2[%c0_3, %c0_4] : memref<16x128xf32, #tpu.memory_space<vmem>>, vector<16x128xf32>
    %c0_5 = arith.constant 0 : index
    %c0_6 = arith.constant 0 : index
    %9 = vector.load %arg3[%c0_5, %c0_6] : memref<32x128xf32, #tpu.memory_space<vmem>>, vector<32x128xf32>
    %c0_7 = arith.constant 0 : index
    %c0_8 = arith.constant 0 : index
    %10 = vector.load %arg4[%c0_7, %c0_8] : memref<1x128xf32, #tpu.memory_space<vmem>>, vector<1x128xf32>
    %cst_9 = arith.constant dense<0.000000e+00> : vector<16x128xf32>
    %11 = tpu.matmul %7, %8, %cst_9 {dimension_numbers = #tpu.dot_dimension_numbers<[1], [0], [0], [1], [0, 0, 1, 1], [], []>} : vector<16x16xf32>, vector<16x128xf32>, vector<16x128xf32> -> vector<16x128xf32>
    %12 = vector.shape_cast %10 : vector<1x128xf32> to vector<1x128xf32>
    %13 = vector.broadcast %12 : vector<1x128xf32> to vector<16x128xf32>
    %14 = arith.addf %11, %13 : vector<16x128xf32>
    %cst_10 = arith.constant 0.000000e+00 : f32
    %15 = vector.broadcast %cst_10 : f32 to vector<2x32xf32>
    %cst_11 = arith.constant 0.000000e+00 : f32
    %16 = vector.broadcast %cst_11 : f32 to vector<2x32xf32>
    %17 = vector.extract_strided_slice %14 {offsets = [0, 0], sizes = [2, 128], strides = [1, 1]} : vector<16x128xf32> to vector<2x128xf32>
    %cst_12 = arith.constant dense<0.000000e+00> : vector<2x128xf32>
    %18 = tpu.matmul %15, %9, %cst_12 {dimension_numbers = #tpu.dot_dimension_numbers<[1], [0], [0], [1], [0, 0, 1, 1], [], []>} : vector<2x32xf32>, vector<32x128xf32>, vector<2x128xf32> -> vector<2x128xf32>
    %19 = arith.addf %17, %18 : vector<2x128xf32>
    %20 = vector.extract_strided_slice %19 {offsets = [0, 0], sizes = [2, 32], strides = [1, 1]} : vector<2x128xf32> to vector<2x32xf32>
    %21 = arith.negf %20 : vector<2x32xf32>
    %22 = math.exp %21 : vector<2x32xf32>
    %cst_13 = arith.constant 1.000000e+00 : f32
    %23 = vector.broadcast %cst_13 : f32 to vector<2x32xf32>
    %24 = arith.addf %23, %22 : vector<2x32xf32>
    %25 = arith.divf %23, %24 : vector<2x32xf32>
    %26 = vector.extract_strided_slice %19 {offsets = [0, 32], sizes = [2, 32], strides = [1, 1]} : vector<2x128xf32> to vector<2x32xf32>
    %27 = arith.negf %26 : vector<2x32xf32>
    %28 = math.exp %27 : vector<2x32xf32>
    %cst_14 = arith.constant 1.000000e+00 : f32
    %29 = vector.broadcast %cst_14 : f32 to vector<2x32xf32>
    %30 = arith.addf %29, %28 : vector<2x32xf32>
    %31 = arith.divf %29, %30 : vector<2x32xf32>
    %32 = vector.extract_strided_slice %19 {offsets = [0, 64], sizes = [2, 32], strides = [1, 1]} : vector<2x128xf32> to vector<2x32xf32>
    %33 = math.tanh %32 : vector<2x32xf32>
    %34 = vector.extract_strided_slice %19 {offsets = [0, 96], sizes = [2, 32], strides = [1, 1]} : vector<2x128xf32> to vector<2x32xf32>
    %35 = arith.negf %34 : vector<2x32xf32>
    %36 = math.exp %35 : vector<2x32xf32>
    %cst_15 = arith.constant 1.000000e+00 : f32
    %37 = vector.broadcast %cst_15 : f32 to vector<2x32xf32>
    %38 = arith.addf %37, %36 : vector<2x32xf32>
    %39 = arith.divf %37, %38 : vector<2x32xf32>
    %40 = arith.mulf %31, %16 : vector<2x32xf32>
    %41 = arith.mulf %25, %33 : vector<2x32xf32>
    %42 = arith.addf %40, %41 : vector<2x32xf32>
    %43 = math.tanh %42 : vector<2x32xf32>
    %44 = arith.mulf %39, %43 : vector<2x32xf32>
    %c0_16 = arith.constant 0 : index
    %c0_17 = arith.constant 0 : index
    %45 = vector.load %arg10[%c0_16, %c0_17] : memref<16x32xf32, #tpu.memory_space<vmem>>, vector<2x32xf32>
    tpu.vector_store %arg10[%c0_16, %c0_17], %44 {strides = array<i32>} : memref<16x32xf32, #tpu.memory_space<vmem>>, vector<2x32xf32>,
    %46 = vector.extract_strided_slice %14 {offsets = [2, 0], sizes = [2, 128], strides = [1, 1]} : vector<16x128xf32> to vector<2x128xf32>
    %cst_18 = arith.constant dense<0.000000e+00> : vector<2x128xf32>
    %47 = tpu.matmul %44, %9, %cst_18 {dimension_numbers = #tpu.dot_dimension_numbers<[1], [0], [0], [1], [0, 0, 1, 1], [], []>} : vector<2x32xf32>, vector<32x128xf32>, vector<2x128xf32> -> vector<2x128xf32>
    %48 = arith.addf %46, %47 : vector<2x128xf32>
    %49 = vector.extract_strided_slice %48 {offsets = [0, 0], sizes = [2, 32], strides = [1, 1]} : vector<2x128xf32> to vector<2x32xf32>
    %50 = arith.negf %49 : vector<2x32xf32>
    %51 = math.exp %50 : vector<2x32xf32>
    %cst_19 = arith.constant 1.000000e+00 : f32
    %52 = vector.broadcast %cst_19 : f32 to vector<2x32xf32>
    %53 = arith.addf %52, %51 : vector<2x32xf32>
    %54 = arith.divf %52, %53 : vector<2x32xf32>
    %55 = vector.extract_strided_slice %48 {offsets = [0, 32], sizes = [2, 32], strides = [1, 1]} : vector<2x128xf32> to vector<2x32xf32>
    %56 = arith.negf %55 : vector<2x32xf32>
    %57 = math.exp %56 : vector<2x32xf32>
    %cst_20 = arith.constant 1.000000e+00 : f32
    %58 = vector.broadcast %cst_20 : f32 to vector<2x32xf32>
    %59 = arith.addf %58, %57 : vector<2x32xf32>
    %60 = arith.divf %58, %59 : vector<2x32xf32>
    %61 = vector.extract_strided_slice %48 {offsets = [0, 64], sizes = [2, 32], strides = [1, 1]} : vector<2x128xf32> to vector<2x32xf32>
    %62 = math.tanh %61 : vector<2x32xf32>
    %63 = vector.extract_strided_slice %48 {offsets = [0, 96], sizes = [2, 32], strides = [1, 1]} : vector<2x128xf32> to vector<2x32xf32>
    %64 = arith.negf %63 : vector<2x32xf32>
    %65 = math.exp %64 : vector<2x32xf32>
    %cst_21 = arith.constant 1.000000e+00 : f32
    %66 = vector.broadcast %cst_21 : f32 to vector<2x32xf32>
    %67 = arith.addf %66, %65 : vector<2x32xf32>
    %68 = arith.divf %66, %67 : vector<2x32xf32>
    %69 = arith.mulf %60, %42 : vector<2x32xf32>
    %70 = arith.mulf %54, %62 : vector<2x32xf32>
    %71 = arith.addf %69, %70 : vector<2x32xf32>
    %72 = math.tanh %71 : vector<2x32xf32>
    %73 = arith.mulf %68, %72 : vector<2x32xf32>
    %c2 = arith.constant 2 : index
    %c0_22 = arith.constant 0 : index
    %74 = vector.load %arg10[%c2, %c0_22] : memref<16x32xf32, #tpu.memory_space<vmem>>, vector<2x32xf32>
    tpu.vector_store %arg10[%c2, %c0_22], %73 {strides = array<i32>} : memref<16x32xf32, #tpu.memory_space<vmem>>, vector<2x32xf32>,
    %75 = vector.extract_strided_slice %14 {offsets = [4, 0], sizes = [2, 128], strides = [1, 1]} : vector<16x128xf32> to vector<2x128xf32>
    %cst_23 = arith.constant dense<0.000000e+00> : vector<2x128xf32>
    %76 = tpu.matmul %73, %9, %cst_23 {dimension_numbers = #tpu.dot_dimension_numbers<[1], [0], [0], [1], [0, 0, 1, 1], [], []>} : vector<2x32xf32>, vector<32x128xf32>, vector<2x128xf32> -> vector<2x128xf32>
    %77 = arith.addf %75, %76 : vector<2x128xf32>
    %78 = vector.extract_strided_slice %77 {offsets = [0, 0], sizes = [2, 32], strides = [1, 1]} : vector<2x128xf32> to vector<2x32xf32>
    %79 = arith.negf %78 : vector<2x32xf32>
    %80 = math.exp %79 : vector<2x32xf32>
    %cst_24 = arith.constant 1.000000e+00 : f32
    %81 = vector.broadcast %cst_24 : f32 to vector<2x32xf32>
    %82 = arith.addf %81, %80 : vector<2x32xf32>
    %83 = arith.divf %81, %82 : vector<2x32xf32>
    %84 = vector.extract_strided_slice %77 {offsets = [0, 32], sizes = [2, 32], strides = [1, 1]} : vector<2x128xf32> to vector<2x32xf32>
    %85 = arith.negf %84 : vector<2x32xf32>
    %86 = math.exp %85 : vector<2x32xf32>
    %cst_25 = arith.constant 1.000000e+00 : f32
    %87 = vector.broadcast %cst_25 : f32 to vector<2x32xf32>
    %88 = arith.addf %87, %86 : vector<2x32xf32>
    %89 = arith.divf %87, %88 : vector<2x32xf32>
    %90 = vector.extract_strided_slice %77 {offsets = [0, 64], sizes = [2, 32], strides = [1, 1]} : vector<2x128xf32> to vector<2x32xf32>
    %91 = math.tanh %90 : vector<2x32xf32>
    %92 = vector.extract_strided_slice %77 {offsets = [0, 96], sizes = [2, 32], strides = [1, 1]} : vector<2x128xf32> to vector<2x32xf32>
    %93 = arith.negf %92 : vector<2x32xf32>
    %94 = math.exp %93 : vector<2x32xf32>
    %cst_26 = arith.constant 1.000000e+00 : f32
    %95 = vector.broadcast %cst_26 : f32 to vector<2x32xf32>
    %96 = arith.addf %95, %94 : vector<2x32xf32>
    %97 = arith.divf %95, %96 : vector<2x32xf32>
    %98 = arith.mulf %89, %71 : vector<2x32xf32>
    %99 = arith.mulf %83, %91 : vector<2x32xf32>
    %100 = arith.addf %98, %99 : vector<2x32xf32>
    %101 = math.tanh %100 : vector<2x32xf32>
    %102 = arith.mulf %97, %101 : vector<2x32xf32>
    %c4 = arith.constant 4 : index
    %c0_27 = arith.constant 0 : index
    %103 = vector.load %arg10[%c4, %c0_27] : memref<16x32xf32, #tpu.memory_space<vmem>>, vector<2x32xf32>
    tpu.vector_store %arg10[%c4, %c0_27], %102 {strides = array<i32>} : memref<16x32xf32, #tpu.memory_space<vmem>>, vector<2x32xf32>,
    %104 = vector.extract_strided_slice %14 {offsets = [6, 0], sizes = [2, 128], strides = [1, 1]} : vector<16x128xf32> to vector<2x128xf32>
    %cst_28 = arith.constant dense<0.000000e+00> : vector<2x128xf32>
    %105 = tpu.matmul %102, %9, %cst_28 {dimension_numbers = #tpu.dot_dimension_numbers<[1], [0], [0], [1], [0, 0, 1, 1], [], []>} : vector<2x32xf32>, vector<32x128xf32>, vector<2x128xf32> -> vector<2x128xf32>
    %106 = arith.addf %104, %105 : vector<2x128xf32>
    %107 = vector.extract_strided_slice %106 {offsets = [0, 0], sizes = [2, 32], strides = [1, 1]} : vector<2x128xf32> to vector<2x32xf32>
    %108 = arith.negf %107 : vector<2x32xf32>
    %109 = math.exp %108 : vector<2x32xf32>
    %cst_29 = arith.constant 1.000000e+00 : f32
    %110 = vector.broadcast %cst_29 : f32 to vector<2x32xf32>
    %111 = arith.addf %110, %109 : vector<2x32xf32>
    %112 = arith.divf %110, %111 : vector<2x32xf32>
    %113 = vector.extract_strided_slice %106 {offsets = [0, 32], sizes = [2, 32], strides = [1, 1]} : vector<2x128xf32> to vector<2x32xf32>
    %114 = arith.negf %113 : vector<2x32xf32>
    %115 = math.exp %114 : vector<2x32xf32>
    %cst_30 = arith.constant 1.000000e+00 : f32
    %116 = vector.broadcast %cst_30 : f32 to vector<2x32xf32>
    %117 = arith.addf %116, %115 : vector<2x32xf32>
    %118 = arith.divf %116, %117 : vector<2x32xf32>
    %119 = vector.extract_strided_slice %106 {offsets = [0, 64], sizes = [2, 32], strides = [1, 1]} : vector<2x128xf32> to vector<2x32xf32>
    %120 = math.tanh %119 : vector<2x32xf32>
    %121 = vector.extract_strided_slice %106 {offsets = [0, 96], sizes = [2, 32], strides = [1, 1]} : vector<2x128xf32> to vector<2x32xf32>
    %122 = arith.negf %121 : vector<2x32xf32>
    %123 = math.exp %122 : vector<2x32xf32>
    %cst_31 = arith.constant 1.000000e+00 : f32
    %124 = vector.broadcast %cst_31 : f32 to vector<2x32xf32>
    %125 = arith.addf %124, %123 : vector<2x32xf32>
    %126 = arith.divf %124, %125 : vector<2x32xf32>
    %127 = arith.mulf %118, %100 : vector<2x32xf32>
    %128 = arith.mulf %112, %120 : vector<2x32xf32>
    %129 = arith.addf %127, %128 : vector<2x32xf32>
    %130 = math.tanh %129 : vector<2x32xf32>
    %131 = arith.mulf %126, %130 : vector<2x32xf32>
    %c6 = arith.constant 6 : index
    %c0_32 = arith.constant 0 : index
    %132 = vector.load %arg10[%c6, %c0_32] : memref<16x32xf32, #tpu.memory_space<vmem>>, vector<2x32xf32>
    tpu.vector_store %arg10[%c6, %c0_32], %131 {strides = array<i32>} : memref<16x32xf32, #tpu.memory_space<vmem>>, vector<2x32xf32>,
    %133 = vector.extract_strided_slice %14 {offsets = [8, 0], sizes = [2, 128], strides = [1, 1]} : vector<16x128xf32> to vector<2x128xf32>
    %cst_33 = arith.constant dense<0.000000e+00> : vector<2x128xf32>
    %134 = tpu.matmul %131, %9, %cst_33 {dimension_numbers = #tpu.dot_dimension_numbers<[1], [0], [0], [1], [0, 0, 1, 1], [], []>} : vector<2x32xf32>, vector<32x128xf32>, vector<2x128xf32> -> vector<2x128xf32>
    %135 = arith.addf %133, %134 : vector<2x128xf32>
    %136 = vector.extract_strided_slice %135 {offsets = [0, 0], sizes = [2, 32], strides = [1, 1]} : vector<2x128xf32> to vector<2x32xf32>
    %137 = arith.negf %136 : vector<2x32xf32>
    %138 = math.exp %137 : vector<2x32xf32>
    %cst_34 = arith.constant 1.000000e+00 : f32
    %139 = vector.broadcast %cst_34 : f32 to vector<2x32xf32>
    %140 = arith.addf %139, %138 : vector<2x32xf32>
    %141 = arith.divf %139, %140 : vector<2x32xf32>
    %142 = vector.extract_strided_slice %135 {offsets = [0, 32], sizes = [2, 32], strides = [1, 1]} : vector<2x128xf32> to vector<2x32xf32>
    %143 = arith.negf %142 : vector<2x32xf32>
    %144 = math.exp %143 : vector<2x32xf32>
    %cst_35 = arith.constant 1.000000e+00 : f32
    %145 = vector.broadcast %cst_35 : f32 to vector<2x32xf32>
    %146 = arith.addf %145, %144 : vector<2x32xf32>
    %147 = arith.divf %145, %146 : vector<2x32xf32>
    %148 = vector.extract_strided_slice %135 {offsets = [0, 64], sizes = [2, 32], strides = [1, 1]} : vector<2x128xf32> to vector<2x32xf32>
    %149 = math.tanh %148 : vector<2x32xf32>
    %150 = vector.extract_strided_slice %135 {offsets = [0, 96], sizes = [2, 32], strides = [1, 1]} : vector<2x128xf32> to vector<2x32xf32>
    %151 = arith.negf %150 : vector<2x32xf32>
    %152 = math.exp %151 : vector<2x32xf32>
    %cst_36 = arith.constant 1.000000e+00 : f32
    %153 = vector.broadcast %cst_36 : f32 to vector<2x32xf32>
    %154 = arith.addf %153, %152 : vector<2x32xf32>
    %155 = arith.divf %153, %154 : vector<2x32xf32>
    %156 = arith.mulf %147, %129 : vector<2x32xf32>
    %157 = arith.mulf %141, %149 : vector<2x32xf32>
    %158 = arith.addf %156, %157 : vector<2x32xf32>
    %159 = math.tanh %158 : vector<2x32xf32>
    %160 = arith.mulf %155, %159 : vector<2x32xf32>
    %c8 = arith.constant 8 : index
    %c0_37 = arith.constant 0 : index
    %161 = vector.load %arg10[%c8, %c0_37] : memref<16x32xf32, #tpu.memory_space<vmem>>, vector<2x32xf32>
    tpu.vector_store %arg10[%c8, %c0_37], %160 {strides = array<i32>} : memref<16x32xf32, #tpu.memory_space<vmem>>, vector<2x32xf32>,
    %162 = vector.extract_strided_slice %14 {offsets = [10, 0], sizes = [2, 128], strides = [1, 1]} : vector<16x128xf32> to vector<2x128xf32>
    %cst_38 = arith.constant dense<0.000000e+00> : vector<2x128xf32>
    %163 = tpu.matmul %160, %9, %cst_38 {dimension_numbers = #tpu.dot_dimension_numbers<[1], [0], [0], [1], [0, 0, 1, 1], [], []>} : vector<2x32xf32>, vector<32x128xf32>, vector<2x128xf32> -> vector<2x128xf32>
    %164 = arith.addf %162, %163 : vector<2x128xf32>
    %165 = vector.extract_strided_slice %164 {offsets = [0, 0], sizes = [2, 32], strides = [1, 1]} : vector<2x128xf32> to vector<2x32xf32>
    %166 = arith.negf %165 : vector<2x32xf32>
    %167 = math.exp %166 : vector<2x32xf32>
    %cst_39 = arith.constant 1.000000e+00 : f32
    %168 = vector.broadcast %cst_39 : f32 to vector<2x32xf32>
    %169 = arith.addf %168, %167 : vector<2x32xf32>
    %170 = arith.divf %168, %169 : vector<2x32xf32>
    %171 = vector.extract_strided_slice %164 {offsets = [0, 32], sizes = [2, 32], strides = [1, 1]} : vector<2x128xf32> to vector<2x32xf32>
    %172 = arith.negf %171 : vector<2x32xf32>
    %173 = math.exp %172 : vector<2x32xf32>
    %cst_40 = arith.constant 1.000000e+00 : f32
    %174 = vector.broadcast %cst_40 : f32 to vector<2x32xf32>
    %175 = arith.addf %174, %173 : vector<2x32xf32>
    %176 = arith.divf %174, %175 : vector<2x32xf32>
    %177 = vector.extract_strided_slice %164 {offsets = [0, 64], sizes = [2, 32], strides = [1, 1]} : vector<2x128xf32> to vector<2x32xf32>
    %178 = math.tanh %177 : vector<2x32xf32>
    %179 = vector.extract_strided_slice %164 {offsets = [0, 96], sizes = [2, 32], strides = [1, 1]} : vector<2x128xf32> to vector<2x32xf32>
    %180 = arith.negf %179 : vector<2x32xf32>
    %181 = math.exp %180 : vector<2x32xf32>
    %cst_41 = arith.constant 1.000000e+00 : f32
    %182 = vector.broadcast %cst_41 : f32 to vector<2x32xf32>
    %183 = arith.addf %182, %181 : vector<2x32xf32>
    %184 = arith.divf %182, %183 : vector<2x32xf32>
    %185 = arith.mulf %176, %158 : vector<2x32xf32>
    %186 = arith.mulf %170, %178 : vector<2x32xf32>
    %187 = arith.addf %185, %186 : vector<2x32xf32>
    %188 = math.tanh %187 : vector<2x32xf32>
    %189 = arith.mulf %184, %188 : vector<2x32xf32>
    %c10 = arith.constant 10 : index
    %c0_42 = arith.constant 0 : index
    %190 = vector.load %arg10[%c10, %c0_42] : memref<16x32xf32, #tpu.memory_space<vmem>>, vector<2x32xf32>
    tpu.vector_store %arg10[%c10, %c0_42], %189 {strides = array<i32>} : memref<16x32xf32, #tpu.memory_space<vmem>>, vector<2x32xf32>,
    %191 = vector.extract_strided_slice %14 {offsets = [12, 0], sizes = [2, 128], strides = [1, 1]} : vector<16x128xf32> to vector<2x128xf32>
    %cst_43 = arith.constant dense<0.000000e+00> : vector<2x128xf32>
    %192 = tpu.matmul %189, %9, %cst_43 {dimension_numbers = #tpu.dot_dimension_numbers<[1], [0], [0], [1], [0, 0, 1, 1], [], []>} : vector<2x32xf32>, vector<32x128xf32>, vector<2x128xf32> -> vector<2x128xf32>
    %193 = arith.addf %191, %192 : vector<2x128xf32>
    %194 = vector.extract_strided_slice %193 {offsets = [0, 0], sizes = [2, 32], strides = [1, 1]} : vector<2x128xf32> to vector<2x32xf32>
    %195 = arith.negf %194 : vector<2x32xf32>
    %196 = math.exp %195 : vector<2x32xf32>
    %cst_44 = arith.constant 1.000000e+00 : f32
    %197 = vector.broadcast %cst_44 : f32 to vector<2x32xf32>
    %198 = arith.addf %197, %196 : vector<2x32xf32>
    %199 = arith.divf %197, %198 : vector<2x32xf32>
    %200 = vector.extract_strided_slice %193 {offsets = [0, 32], sizes = [2, 32], strides = [1, 1]} : vector<2x128xf32> to vector<2x32xf32>
    %201 = arith.negf %200 : vector<2x32xf32>
    %202 = math.exp %201 : vector<2x32xf32>
    %cst_45 = arith.constant 1.000000e+00 : f32
    %203 = vector.broadcast %cst_45 : f32 to vector<2x32xf32>
    %204 = arith.addf %203, %202 : vector<2x32xf32>
    %205 = arith.divf %203, %204 : vector<2x32xf32>
    %206 = vector.extract_strided_slice %193 {offsets = [0, 64], sizes = [2, 32], strides = [1, 1]} : vector<2x128xf32> to vector<2x32xf32>
    %207 = math.tanh %206 : vector<2x32xf32>
    %208 = vector.extract_strided_slice %193 {offsets = [0, 96], sizes = [2, 32], strides = [1, 1]} : vector<2x128xf32> to vector<2x32xf32>
    %209 = arith.negf %208 : vector<2x32xf32>
    %210 = math.exp %209 : vector<2x32xf32>
    %cst_46 = arith.constant 1.000000e+00 : f32
    %211 = vector.broadcast %cst_46 : f32 to vector<2x32xf32>
    %212 = arith.addf %211, %210 : vector<2x32xf32>
    %213 = arith.divf %211, %212 : vector<2x32xf32>
    %214 = arith.mulf %205, %187 : vector<2x32xf32>
    %215 = arith.mulf %199, %207 : vector<2x32xf32>
    %216 = arith.addf %214, %215 : vector<2x32xf32>
    %217 = math.tanh %216 : vector<2x32xf32>
    %218 = arith.mulf %213, %217 : vector<2x32xf32>
    %c12 = arith.constant 12 : index
    %c0_47 = arith.constant 0 : index
    %219 = vector.load %arg10[%c12, %c0_47] : memref<16x32xf32, #tpu.memory_space<vmem>>, vector<2x32xf32>
    tpu.vector_store %arg10[%c12, %c0_47], %218 {strides = array<i32>} : memref<16x32xf32, #tpu.memory_space<vmem>>, vector<2x32xf32>,
    %220 = vector.extract_strided_slice %14 {offsets = [14, 0], sizes = [2, 128], strides = [1, 1]} : vector<16x128xf32> to vector<2x128xf32>
    %cst_48 = arith.constant dense<0.000000e+00> : vector<2x128xf32>
    %221 = tpu.matmul %218, %9, %cst_48 {dimension_numbers = #tpu.dot_dimension_numbers<[1], [0], [0], [1], [0, 0, 1, 1], [], []>} : vector<2x32xf32>, vector<32x128xf32>, vector<2x128xf32> -> vector<2x128xf32>
    %222 = arith.addf %220, %221 : vector<2x128xf32>
    %223 = vector.extract_strided_slice %222 {offsets = [0, 0], sizes = [2, 32], strides = [1, 1]} : vector<2x128xf32> to vector<2x32xf32>
    %224 = arith.negf %223 : vector<2x32xf32>
    %225 = math.exp %224 : vector<2x32xf32>
    %cst_49 = arith.constant 1.000000e+00 : f32
    %226 = vector.broadcast %cst_49 : f32 to vector<2x32xf32>
    %227 = arith.addf %226, %225 : vector<2x32xf32>
    %228 = arith.divf %226, %227 : vector<2x32xf32>
    %229 = vector.extract_strided_slice %222 {offsets = [0, 32], sizes = [2, 32], strides = [1, 1]} : vector<2x128xf32> to vector<2x32xf32>
    %230 = arith.negf %229 : vector<2x32xf32>
    %231 = math.exp %230 : vector<2x32xf32>
    %cst_50 = arith.constant 1.000000e+00 : f32
    %232 = vector.broadcast %cst_50 : f32 to vector<2x32xf32>
    %233 = arith.addf %232, %231 : vector<2x32xf32>
    %234 = arith.divf %232, %233 : vector<2x32xf32>
    %235 = vector.extract_strided_slice %222 {offsets = [0, 64], sizes = [2, 32], strides = [1, 1]} : vector<2x128xf32> to vector<2x32xf32>
    %236 = math.tanh %235 : vector<2x32xf32>
    %237 = vector.extract_strided_slice %222 {offsets = [0, 96], sizes = [2, 32], strides = [1, 1]} : vector<2x128xf32> to vector<2x32xf32>
    %238 = arith.negf %237 : vector<2x32xf32>
    %239 = math.exp %238 : vector<2x32xf32>
    %cst_51 = arith.constant 1.000000e+00 : f32
    %240 = vector.broadcast %cst_51 : f32 to vector<2x32xf32>
    %241 = arith.addf %240, %239 : vector<2x32xf32>
    %242 = arith.divf %240, %241 : vector<2x32xf32>
    %243 = arith.mulf %234, %216 : vector<2x32xf32>
    %244 = arith.mulf %228, %236 : vector<2x32xf32>
    %245 = arith.addf %243, %244 : vector<2x32xf32>
    %246 = math.tanh %245 : vector<2x32xf32>
    %247 = arith.mulf %242, %246 : vector<2x32xf32>
    %c14 = arith.constant 14 : index
    %c0_52 = arith.constant 0 : index
    %248 = vector.load %arg10[%c14, %c0_52] : memref<16x32xf32, #tpu.memory_space<vmem>>, vector<2x32xf32>
    tpu.vector_store %arg10[%c14, %c0_52], %247 {strides = array<i32>} : memref<16x32xf32, #tpu.memory_space<vmem>>, vector<2x32xf32>,
    %c0_53 = arith.constant 0 : index
    %c0_54 = arith.constant 0 : index
    %c0_55 = arith.constant 0 : index
    %249 = vector.load %arg8[%c0_53, %c0_54, %c0_55] : memref<2x2x32xf32, #tpu.memory_space<vmem>>, vector<1x2x32xf32>
    %250 = vector.shape_cast %249 : vector<1x2x32xf32> to vector<2x32xf32>
    %251 = vector.shape_cast %247 : vector<2x32xf32> to vector<1x2x32xf32>
    tpu.vector_store %arg8[%c0_53, %c0_54, %c0_55], %251 {strides = array<i32>} : memref<2x2x32xf32, #tpu.memory_space<vmem>>, vector<1x2x32xf32>,
    %c0_56 = arith.constant 0 : index
    %c0_57 = arith.constant 0 : index
    %c0_58 = arith.constant 0 : index
    %252 = vector.load %arg9[%c0_56, %c0_57, %c0_58] : memref<2x2x32xf32, #tpu.memory_space<vmem>>, vector<1x2x32xf32>
    %253 = vector.shape_cast %252 : vector<1x2x32xf32> to vector<2x32xf32>
    %254 = vector.shape_cast %245 : vector<2x32xf32> to vector<1x2x32xf32>
    tpu.vector_store %arg9[%c0_56, %c0_57, %c0_58], %254 {strides = array<i32>} : memref<2x2x32xf32, #tpu.memory_space<vmem>>, vector<1x2x32xf32>,
    %c0_59 = arith.constant 0 : index
    %c0_60 = arith.constant 0 : index
    %255 = vector.load %arg5[%c0_59, %c0_60] : memref<32x128xf32, #tpu.memory_space<vmem>>, vector<32x128xf32>
    %c0_61 = arith.constant 0 : index
    %c0_62 = arith.constant 0 : index
    %256 = vector.load %arg6[%c0_61, %c0_62] : memref<32x128xf32, #tpu.memory_space<vmem>>, vector<32x128xf32>
    %c0_63 = arith.constant 0 : index
    %c0_64 = arith.constant 0 : index
    %257 = vector.load %arg7[%c0_63, %c0_64] : memref<1x128xf32, #tpu.memory_space<vmem>>, vector<1x128xf32>
    %c0_65 = arith.constant 0 : index
    %c0_66 = arith.constant 0 : index
    %258 = vector.load %arg10[%c0_65, %c0_66] : memref<16x32xf32, #tpu.memory_space<vmem>>, vector<16x32xf32>
    %cst_67 = arith.constant dense<0.000000e+00> : vector<16x128xf32>
    %259 = tpu.matmul %258, %255, %cst_67 {dimension_numbers = #tpu.dot_dimension_numbers<[1], [0], [0], [1], [0, 0, 1, 1], [], []>} : vector<16x32xf32>, vector<32x128xf32>, vector<16x128xf32> -> vector<16x128xf32>
    %260 = vector.shape_cast %257 : vector<1x128xf32> to vector<1x128xf32>
    %261 = vector.broadcast %260 : vector<1x128xf32> to vector<16x128xf32>
    %262 = arith.addf %259, %261 : vector<16x128xf32>
    %cst_68 = arith.constant 0.000000e+00 : f32
    %263 = vector.broadcast %cst_68 : f32 to vector<2x32xf32>
    %cst_69 = arith.constant 0.000000e+00 : f32
    %264 = vector.broadcast %cst_69 : f32 to vector<2x32xf32>
    %265 = vector.extract_strided_slice %262 {offsets = [0, 0], sizes = [2, 128], strides = [1, 1]} : vector<16x128xf32> to vector<2x128xf32>
    %cst_70 = arith.constant dense<0.000000e+00> : vector<2x128xf32>
    %266 = tpu.matmul %263, %256, %cst_70 {dimension_numbers = #tpu.dot_dimension_numbers<[1], [0], [0], [1], [0, 0, 1, 1], [], []>} : vector<2x32xf32>, vector<32x128xf32>, vector<2x128xf32> -> vector<2x128xf32>
    %267 = arith.addf %265, %266 : vector<2x128xf32>
    %268 = vector.extract_strided_slice %267 {offsets = [0, 0], sizes = [2, 32], strides = [1, 1]} : vector<2x128xf32> to vector<2x32xf32>
    %269 = arith.negf %268 : vector<2x32xf32>
    %270 = math.exp %269 : vector<2x32xf32>
    %cst_71 = arith.constant 1.000000e+00 : f32
    %271 = vector.broadcast %cst_71 : f32 to vector<2x32xf32>
    %272 = arith.addf %271, %270 : vector<2x32xf32>
    %273 = arith.divf %271, %272 : vector<2x32xf32>
    %274 = vector.extract_strided_slice %267 {offsets = [0, 32], sizes = [2, 32], strides = [1, 1]} : vector<2x128xf32> to vector<2x32xf32>
    %275 = arith.negf %274 : vector<2x32xf32>
    %276 = math.exp %275 : vector<2x32xf32>
    %cst_72 = arith.constant 1.000000e+00 : f32
    %277 = vector.broadcast %cst_72 : f32 to vector<2x32xf32>
    %278 = arith.addf %277, %276 : vector<2x32xf32>
    %279 = arith.divf %277, %278 : vector<2x32xf32>
    %280 = vector.extract_strided_slice %267 {offsets = [0, 64], sizes = [2, 32], strides = [1, 1]} : vector<2x128xf32> to vector<2x32xf32>
    %281 = math.tanh %280 : vector<2x32xf32>
    %282 = vector.extract_strided_slice %267 {offsets = [0, 96], sizes = [2, 32], strides = [1, 1]} : vector<2x128xf32> to vector<2x32xf32>
    %283 = arith.negf %282 : vector<2x32xf32>
    %284 = math.exp %283 : vector<2x32xf32>
    %cst_73 = arith.constant 1.000000e+00 : f32
    %285 = vector.broadcast %cst_73 : f32 to vector<2x32xf32>
    %286 = arith.addf %285, %284 : vector<2x32xf32>
    %287 = arith.divf %285, %286 : vector<2x32xf32>
    %288 = arith.mulf %279, %264 : vector<2x32xf32>
    %289 = arith.mulf %273, %281 : vector<2x32xf32>
    %290 = arith.addf %288, %289 : vector<2x32xf32>
    %291 = math.tanh %290 : vector<2x32xf32>
    %292 = arith.mulf %287, %291 : vector<2x32xf32>
    %293 = vector.extract_strided_slice %262 {offsets = [2, 0], sizes = [2, 128], strides = [1, 1]} : vector<16x128xf32> to vector<2x128xf32>
    %cst_74 = arith.constant dense<0.000000e+00> : vector<2x128xf32>
    %294 = tpu.matmul %292, %256, %cst_74 {dimension_numbers = #tpu.dot_dimension_numbers<[1], [0], [0], [1], [0, 0, 1, 1], [], []>} : vector<2x32xf32>, vector<32x128xf32>, vector<2x128xf32> -> vector<2x128xf32>
    %295 = arith.addf %293, %294 : vector<2x128xf32>
    %296 = vector.extract_strided_slice %295 {offsets = [0, 0], sizes = [2, 32], strides = [1, 1]} : vector<2x128xf32> to vector<2x32xf32>
    %297 = arith.negf %296 : vector<2x32xf32>
    %298 = math.exp %297 : vector<2x32xf32>
    %cst_75 = arith.constant 1.000000e+00 : f32
    %299 = vector.broadcast %cst_75 : f32 to vector<2x32xf32>
    %300 = arith.addf %299, %298 : vector<2x32xf32>
    %301 = arith.divf %299, %300 : vector<2x32xf32>
    %302 = vector.extract_strided_slice %295 {offsets = [0, 32], sizes = [2, 32], strides = [1, 1]} : vector<2x128xf32> to vector<2x32xf32>
    %303 = arith.negf %302 : vector<2x32xf32>
    %304 = math.exp %303 : vector<2x32xf32>
    %cst_76 = arith.constant 1.000000e+00 : f32
    %305 = vector.broadcast %cst_76 : f32 to vector<2x32xf32>
    %306 = arith.addf %305, %304 : vector<2x32xf32>
    %307 = arith.divf %305, %306 : vector<2x32xf32>
    %308 = vector.extract_strided_slice %295 {offsets = [0, 64], sizes = [2, 32], strides = [1, 1]} : vector<2x128xf32> to vector<2x32xf32>
    %309 = math.tanh %308 : vector<2x32xf32>
    %310 = vector.extract_strided_slice %295 {offsets = [0, 96], sizes = [2, 32], strides = [1, 1]} : vector<2x128xf32> to vector<2x32xf32>
    %311 = arith.negf %310 : vector<2x32xf32>
    %312 = math.exp %311 : vector<2x32xf32>
    %cst_77 = arith.constant 1.000000e+00 : f32
    %313 = vector.broadcast %cst_77 : f32 to vector<2x32xf32>
    %314 = arith.addf %313, %312 : vector<2x32xf32>
    %315 = arith.divf %313, %314 : vector<2x32xf32>
    %316 = arith.mulf %307, %290 : vector<2x32xf32>
    %317 = arith.mulf %301, %309 : vector<2x32xf32>
    %318 = arith.addf %316, %317 : vector<2x32xf32>
    %319 = math.tanh %318 : vector<2x32xf32>
    %320 = arith.mulf %315, %319 : vector<2x32xf32>
    %321 = vector.extract_strided_slice %262 {offsets = [4, 0], sizes = [2, 128], strides = [1, 1]} : vector<16x128xf32> to vector<2x128xf32>
    %cst_78 = arith.constant dense<0.000000e+00> : vector<2x128xf32>
    %322 = tpu.matmul %320, %256, %cst_78 {dimension_numbers = #tpu.dot_dimension_numbers<[1], [0], [0], [1], [0, 0, 1, 1], [], []>} : vector<2x32xf32>, vector<32x128xf32>, vector<2x128xf32> -> vector<2x128xf32>
    %323 = arith.addf %321, %322 : vector<2x128xf32>
    %324 = vector.extract_strided_slice %323 {offsets = [0, 0], sizes = [2, 32], strides = [1, 1]} : vector<2x128xf32> to vector<2x32xf32>
    %325 = arith.negf %324 : vector<2x32xf32>
    %326 = math.exp %325 : vector<2x32xf32>
    %cst_79 = arith.constant 1.000000e+00 : f32
    %327 = vector.broadcast %cst_79 : f32 to vector<2x32xf32>
    %328 = arith.addf %327, %326 : vector<2x32xf32>
    %329 = arith.divf %327, %328 : vector<2x32xf32>
    %330 = vector.extract_strided_slice %323 {offsets = [0, 32], sizes = [2, 32], strides = [1, 1]} : vector<2x128xf32> to vector<2x32xf32>
    %331 = arith.negf %330 : vector<2x32xf32>
    %332 = math.exp %331 : vector<2x32xf32>
    %cst_80 = arith.constant 1.000000e+00 : f32
    %333 = vector.broadcast %cst_80 : f32 to vector<2x32xf32>
    %334 = arith.addf %333, %332 : vector<2x32xf32>
    %335 = arith.divf %333, %334 : vector<2x32xf32>
    %336 = vector.extract_strided_slice %323 {offsets = [0, 64], sizes = [2, 32], strides = [1, 1]} : vector<2x128xf32> to vector<2x32xf32>
    %337 = math.tanh %336 : vector<2x32xf32>
    %338 = vector.extract_strided_slice %323 {offsets = [0, 96], sizes = [2, 32], strides = [1, 1]} : vector<2x128xf32> to vector<2x32xf32>
    %339 = arith.negf %338 : vector<2x32xf32>
    %340 = math.exp %339 : vector<2x32xf32>
    %cst_81 = arith.constant 1.000000e+00 : f32
    %341 = vector.broadcast %cst_81 : f32 to vector<2x32xf32>
    %342 = arith.addf %341, %340 : vector<2x32xf32>
    %343 = arith.divf %341, %342 : vector<2x32xf32>
    %344 = arith.mulf %335, %318 : vector<2x32xf32>
    %345 = arith.mulf %329, %337 : vector<2x32xf32>
    %346 = arith.addf %344, %345 : vector<2x32xf32>
    %347 = math.tanh %346 : vector<2x32xf32>
    %348 = arith.mulf %343, %347 : vector<2x32xf32>
    %349 = vector.extract_strided_slice %262 {offsets = [6, 0], sizes = [2, 128], strides = [1, 1]} : vector<16x128xf32> to vector<2x128xf32>
    %cst_82 = arith.constant dense<0.000000e+00> : vector<2x128xf32>
    %350 = tpu.matmul %348, %256, %cst_82 {dimension_numbers = #tpu.dot_dimension_numbers<[1], [0], [0], [1], [0, 0, 1, 1], [], []>} : vector<2x32xf32>, vector<32x128xf32>, vector<2x128xf32> -> vector<2x128xf32>
    %351 = arith.addf %349, %350 : vector<2x128xf32>
    %352 = vector.extract_strided_slice %351 {offsets = [0, 0], sizes = [2, 32], strides = [1, 1]} : vector<2x128xf32> to vector<2x32xf32>
    %353 = arith.negf %352 : vector<2x32xf32>
    %354 = math.exp %353 : vector<2x32xf32>
    %cst_83 = arith.constant 1.000000e+00 : f32
    %355 = vector.broadcast %cst_83 : f32 to vector<2x32xf32>
    %356 = arith.addf %355, %354 : vector<2x32xf32>
    %357 = arith.divf %355, %356 : vector<2x32xf32>
    %358 = vector.extract_strided_slice %351 {offsets = [0, 32], sizes = [2, 32], strides = [1, 1]} : vector<2x128xf32> to vector<2x32xf32>
    %359 = arith.negf %358 : vector<2x32xf32>
    %360 = math.exp %359 : vector<2x32xf32>
    %cst_84 = arith.constant 1.000000e+00 : f32
    %361 = vector.broadcast %cst_84 : f32 to vector<2x32xf32>
    %362 = arith.addf %361, %360 : vector<2x32xf32>
    %363 = arith.divf %361, %362 : vector<2x32xf32>
    %364 = vector.extract_strided_slice %351 {offsets = [0, 64], sizes = [2, 32], strides = [1, 1]} : vector<2x128xf32> to vector<2x32xf32>
    %365 = math.tanh %364 : vector<2x32xf32>
    %366 = vector.extract_strided_slice %351 {offsets = [0, 96], sizes = [2, 32], strides = [1, 1]} : vector<2x128xf32> to vector<2x32xf32>
    %367 = arith.negf %366 : vector<2x32xf32>
    %368 = math.exp %367 : vector<2x32xf32>
    %cst_85 = arith.constant 1.000000e+00 : f32
    %369 = vector.broadcast %cst_85 : f32 to vector<2x32xf32>
    %370 = arith.addf %369, %368 : vector<2x32xf32>
    %371 = arith.divf %369, %370 : vector<2x32xf32>
    %372 = arith.mulf %363, %346 : vector<2x32xf32>
    %373 = arith.mulf %357, %365 : vector<2x32xf32>
    %374 = arith.addf %372, %373 : vector<2x32xf32>
    %375 = math.tanh %374 : vector<2x32xf32>
    %376 = arith.mulf %371, %375 : vector<2x32xf32>
    %377 = vector.extract_strided_slice %262 {offsets = [8, 0], sizes = [2, 128], strides = [1, 1]} : vector<16x128xf32> to vector<2x128xf32>
    %cst_86 = arith.constant dense<0.000000e+00> : vector<2x128xf32>
    %378 = tpu.matmul %376, %256, %cst_86 {dimension_numbers = #tpu.dot_dimension_numbers<[1], [0], [0], [1], [0, 0, 1, 1], [], []>} : vector<2x32xf32>, vector<32x128xf32>, vector<2x128xf32> -> vector<2x128xf32>
    %379 = arith.addf %377, %378 : vector<2x128xf32>
    %380 = vector.extract_strided_slice %379 {offsets = [0, 0], sizes = [2, 32], strides = [1, 1]} : vector<2x128xf32> to vector<2x32xf32>
    %381 = arith.negf %380 : vector<2x32xf32>
    %382 = math.exp %381 : vector<2x32xf32>
    %cst_87 = arith.constant 1.000000e+00 : f32
    %383 = vector.broadcast %cst_87 : f32 to vector<2x32xf32>
    %384 = arith.addf %383, %382 : vector<2x32xf32>
    %385 = arith.divf %383, %384 : vector<2x32xf32>
    %386 = vector.extract_strided_slice %379 {offsets = [0, 32], sizes = [2, 32], strides = [1, 1]} : vector<2x128xf32> to vector<2x32xf32>
    %387 = arith.negf %386 : vector<2x32xf32>
    %388 = math.exp %387 : vector<2x32xf32>
    %cst_88 = arith.constant 1.000000e+00 : f32
    %389 = vector.broadcast %cst_88 : f32 to vector<2x32xf32>
    %390 = arith.addf %389, %388 : vector<2x32xf32>
    %391 = arith.divf %389, %390 : vector<2x32xf32>
    %392 = vector.extract_strided_slice %379 {offsets = [0, 64], sizes = [2, 32], strides = [1, 1]} : vector<2x128xf32> to vector<2x32xf32>
    %393 = math.tanh %392 : vector<2x32xf32>
    %394 = vector.extract_strided_slice %379 {offsets = [0, 96], sizes = [2, 32], strides = [1, 1]} : vector<2x128xf32> to vector<2x32xf32>
    %395 = arith.negf %394 : vector<2x32xf32>
    %396 = math.exp %395 : vector<2x32xf32>
    %cst_89 = arith.constant 1.000000e+00 : f32
    %397 = vector.broadcast %cst_89 : f32 to vector<2x32xf32>
    %398 = arith.addf %397, %396 : vector<2x32xf32>
    %399 = arith.divf %397, %398 : vector<2x32xf32>
    %400 = arith.mulf %391, %374 : vector<2x32xf32>
    %401 = arith.mulf %385, %393 : vector<2x32xf32>
    %402 = arith.addf %400, %401 : vector<2x32xf32>
    %403 = math.tanh %402 : vector<2x32xf32>
    %404 = arith.mulf %399, %403 : vector<2x32xf32>
    %405 = vector.extract_strided_slice %262 {offsets = [10, 0], sizes = [2, 128], strides = [1, 1]} : vector<16x128xf32> to vector<2x128xf32>
    %cst_90 = arith.constant dense<0.000000e+00> : vector<2x128xf32>
    %406 = tpu.matmul %404, %256, %cst_90 {dimension_numbers = #tpu.dot_dimension_numbers<[1], [0], [0], [1], [0, 0, 1, 1], [], []>} : vector<2x32xf32>, vector<32x128xf32>, vector<2x128xf32> -> vector<2x128xf32>
    %407 = arith.addf %405, %406 : vector<2x128xf32>
    %408 = vector.extract_strided_slice %407 {offsets = [0, 0], sizes = [2, 32], strides = [1, 1]} : vector<2x128xf32> to vector<2x32xf32>
    %409 = arith.negf %408 : vector<2x32xf32>
    %410 = math.exp %409 : vector<2x32xf32>
    %cst_91 = arith.constant 1.000000e+00 : f32
    %411 = vector.broadcast %cst_91 : f32 to vector<2x32xf32>
    %412 = arith.addf %411, %410 : vector<2x32xf32>
    %413 = arith.divf %411, %412 : vector<2x32xf32>
    %414 = vector.extract_strided_slice %407 {offsets = [0, 32], sizes = [2, 32], strides = [1, 1]} : vector<2x128xf32> to vector<2x32xf32>
    %415 = arith.negf %414 : vector<2x32xf32>
    %416 = math.exp %415 : vector<2x32xf32>
    %cst_92 = arith.constant 1.000000e+00 : f32
    %417 = vector.broadcast %cst_92 : f32 to vector<2x32xf32>
    %418 = arith.addf %417, %416 : vector<2x32xf32>
    %419 = arith.divf %417, %418 : vector<2x32xf32>
    %420 = vector.extract_strided_slice %407 {offsets = [0, 64], sizes = [2, 32], strides = [1, 1]} : vector<2x128xf32> to vector<2x32xf32>
    %421 = math.tanh %420 : vector<2x32xf32>
    %422 = vector.extract_strided_slice %407 {offsets = [0, 96], sizes = [2, 32], strides = [1, 1]} : vector<2x128xf32> to vector<2x32xf32>
    %423 = arith.negf %422 : vector<2x32xf32>
    %424 = math.exp %423 : vector<2x32xf32>
    %cst_93 = arith.constant 1.000000e+00 : f32
    %425 = vector.broadcast %cst_93 : f32 to vector<2x32xf32>
    %426 = arith.addf %425, %424 : vector<2x32xf32>
    %427 = arith.divf %425, %426 : vector<2x32xf32>
    %428 = arith.mulf %419, %402 : vector<2x32xf32>
    %429 = arith.mulf %413, %421 : vector<2x32xf32>
    %430 = arith.addf %428, %429 : vector<2x32xf32>
    %431 = math.tanh %430 : vector<2x32xf32>
    %432 = arith.mulf %427, %431 : vector<2x32xf32>
    %433 = vector.extract_strided_slice %262 {offsets = [12, 0], sizes = [2, 128], strides = [1, 1]} : vector<16x128xf32> to vector<2x128xf32>
    %cst_94 = arith.constant dense<0.000000e+00> : vector<2x128xf32>
    %434 = tpu.matmul %432, %256, %cst_94 {dimension_numbers = #tpu.dot_dimension_numbers<[1], [0], [0], [1], [0, 0, 1, 1], [], []>} : vector<2x32xf32>, vector<32x128xf32>, vector<2x128xf32> -> vector<2x128xf32>
    %435 = arith.addf %433, %434 : vector<2x128xf32>
    %436 = vector.extract_strided_slice %435 {offsets = [0, 0], sizes = [2, 32], strides = [1, 1]} : vector<2x128xf32> to vector<2x32xf32>
    %437 = arith.negf %436 : vector<2x32xf32>
    %438 = math.exp %437 : vector<2x32xf32>
    %cst_95 = arith.constant 1.000000e+00 : f32
    %439 = vector.broadcast %cst_95 : f32 to vector<2x32xf32>
    %440 = arith.addf %439, %438 : vector<2x32xf32>
    %441 = arith.divf %439, %440 : vector<2x32xf32>
    %442 = vector.extract_strided_slice %435 {offsets = [0, 32], sizes = [2, 32], strides = [1, 1]} : vector<2x128xf32> to vector<2x32xf32>
    %443 = arith.negf %442 : vector<2x32xf32>
    %444 = math.exp %443 : vector<2x32xf32>
    %cst_96 = arith.constant 1.000000e+00 : f32
    %445 = vector.broadcast %cst_96 : f32 to vector<2x32xf32>
    %446 = arith.addf %445, %444 : vector<2x32xf32>
    %447 = arith.divf %445, %446 : vector<2x32xf32>
    %448 = vector.extract_strided_slice %435 {offsets = [0, 64], sizes = [2, 32], strides = [1, 1]} : vector<2x128xf32> to vector<2x32xf32>
    %449 = math.tanh %448 : vector<2x32xf32>
    %450 = vector.extract_strided_slice %435 {offsets = [0, 96], sizes = [2, 32], strides = [1, 1]} : vector<2x128xf32> to vector<2x32xf32>
    %451 = arith.negf %450 : vector<2x32xf32>
    %452 = math.exp %451 : vector<2x32xf32>
    %cst_97 = arith.constant 1.000000e+00 : f32
    %453 = vector.broadcast %cst_97 : f32 to vector<2x32xf32>
    %454 = arith.addf %453, %452 : vector<2x32xf32>
    %455 = arith.divf %453, %454 : vector<2x32xf32>
    %456 = arith.mulf %447, %430 : vector<2x32xf32>
    %457 = arith.mulf %441, %449 : vector<2x32xf32>
    %458 = arith.addf %456, %457 : vector<2x32xf32>
    %459 = math.tanh %458 : vector<2x32xf32>
    %460 = arith.mulf %455, %459 : vector<2x32xf32>
    %461 = vector.extract_strided_slice %262 {offsets = [14, 0], sizes = [2, 128], strides = [1, 1]} : vector<16x128xf32> to vector<2x128xf32>
    %cst_98 = arith.constant dense<0.000000e+00> : vector<2x128xf32>
    %462 = tpu.matmul %460, %256, %cst_98 {dimension_numbers = #tpu.dot_dimension_numbers<[1], [0], [0], [1], [0, 0, 1, 1], [], []>} : vector<2x32xf32>, vector<32x128xf32>, vector<2x128xf32> -> vector<2x128xf32>
    %463 = arith.addf %461, %462 : vector<2x128xf32>
    %464 = vector.extract_strided_slice %463 {offsets = [0, 0], sizes = [2, 32], strides = [1, 1]} : vector<2x128xf32> to vector<2x32xf32>
    %465 = arith.negf %464 : vector<2x32xf32>
    %466 = math.exp %465 : vector<2x32xf32>
    %cst_99 = arith.constant 1.000000e+00 : f32
    %467 = vector.broadcast %cst_99 : f32 to vector<2x32xf32>
    %468 = arith.addf %467, %466 : vector<2x32xf32>
    %469 = arith.divf %467, %468 : vector<2x32xf32>
    %470 = vector.extract_strided_slice %463 {offsets = [0, 32], sizes = [2, 32], strides = [1, 1]} : vector<2x128xf32> to vector<2x32xf32>
    %471 = arith.negf %470 : vector<2x32xf32>
    %472 = math.exp %471 : vector<2x32xf32>
    %cst_100 = arith.constant 1.000000e+00 : f32
    %473 = vector.broadcast %cst_100 : f32 to vector<2x32xf32>
    %474 = arith.addf %473, %472 : vector<2x32xf32>
    %475 = arith.divf %473, %474 : vector<2x32xf32>
    %476 = vector.extract_strided_slice %463 {offsets = [0, 64], sizes = [2, 32], strides = [1, 1]} : vector<2x128xf32> to vector<2x32xf32>
    %477 = math.tanh %476 : vector<2x32xf32>
    %478 = vector.extract_strided_slice %463 {offsets = [0, 96], sizes = [2, 32], strides = [1, 1]} : vector<2x128xf32> to vector<2x32xf32>
    %479 = arith.negf %478 : vector<2x32xf32>
    %480 = math.exp %479 : vector<2x32xf32>
    %cst_101 = arith.constant 1.000000e+00 : f32
    %481 = vector.broadcast %cst_101 : f32 to vector<2x32xf32>
    %482 = arith.addf %481, %480 : vector<2x32xf32>
    %483 = arith.divf %481, %482 : vector<2x32xf32>
    %484 = arith.mulf %475, %458 : vector<2x32xf32>
    %485 = arith.mulf %469, %477 : vector<2x32xf32>
    %486 = arith.addf %484, %485 : vector<2x32xf32>
    %487 = math.tanh %486 : vector<2x32xf32>
    %488 = arith.mulf %483, %487 : vector<2x32xf32>
    %c1 = arith.constant 1 : index
    %c0_102 = arith.constant 0 : index
    %c0_103 = arith.constant 0 : index
    %489 = vector.load %arg8[%c1, %c0_102, %c0_103] : memref<2x2x32xf32, #tpu.memory_space<vmem>>, vector<1x2x32xf32>
    %490 = vector.shape_cast %489 : vector<1x2x32xf32> to vector<2x32xf32>
    %491 = vector.shape_cast %488 : vector<2x32xf32> to vector<1x2x32xf32>
    tpu.vector_store %arg8[%c1, %c0_102, %c0_103], %491 {strides = array<i32>} : memref<2x2x32xf32, #tpu.memory_space<vmem>>, vector<1x2x32xf32>,
    %c1_104 = arith.constant 1 : index
    %c0_105 = arith.constant 0 : index
    %c0_106 = arith.constant 0 : index
    %492 = vector.load %arg9[%c1_104, %c0_105, %c0_106] : memref<2x2x32xf32, #tpu.memory_space<vmem>>, vector<1x2x32xf32>
    %493 = vector.shape_cast %492 : vector<1x2x32xf32> to vector<2x32xf32>
    %494 = vector.shape_cast %486 : vector<2x32xf32> to vector<1x2x32xf32>
    tpu.vector_store %arg9[%c1_104, %c0_105, %c0_106], %494 {strides = array<i32>} : memref<2x2x32xf32, #tpu.memory_space<vmem>>, vector<1x2x32xf32>,
    return
  }
}

</mosaic_0001>

<bundles_post_ra>
// kernel: tpu_custom_call.1
= control target key start
LH: loop header
LB: loop body
LE: loop exit
PB: predicated region body
PF: predicated region fallthrough
CT: control target
= control target key end

     0   :  { %15 = vsyncpa [#allocation4], 0  ;;  %s3175_s0 = inlined_call_operand.vmem [shape: s32[16,1], index: 0, kind: input, shape index: {}]   ;;  %s3176_s1 = inlined_call_operand.vmem [shape: f32[50,16], index: 1, kind: input, shape index: {}]   ;;  %s3177_s2 = inlined_call_operand.hbm [shape: f32[16,128], index: 2, kind: input, shape index: {}]   ;;  %s3178_s3 = inlined_call_operand.vmem [shape: f32[32,128], index: 3, kind: input, shape index: {}]   ;;  %s3179_s4 = inlined_call_operand.hbm [shape: f32[1,128], index: 4, kind: input, shape index: {}]   ;;  %s3180_s5 = inlined_call_operand.vmem [shape: f32[32,128], index: 5, kind: input, shape index: {}]   ;;  %s3181_s6 = inlined_call_operand.vmem [shape: f32[32,128], index: 6, kind: input, shape index: {}]   ;;  %s3182_s7 = inlined_call_operand.vmem [shape: f32[1,128], index: 7, kind: input, shape index: {}]   ;;  %s3183_s8 = inlined_call_operand.hbm [shape: f32[2,2,32], index: 8, kind: output, shape index: {0}]   ;;  %s3184_s9 = inlined_call_operand.hbm [shape: f32[2,2,32], index: 9, kind: output, shape index: {1}]  }
   0x1   :  { %16 = vsyncpa [#allocation7], 0 }
   0x2   :  { %17 = vsyncpa [#allocation5], 0 }
   0x3   :  { %18 = vsyncpa [#allocation10], 0  ;;  %s2709_s30 = smov [#allocation3]  }
   0x4   :  { %s28_s10 = sshll.u32 %s2709_s30, 4  ;;  %s29_s10 = int_to_ptr.vmem [resolvable:$true] %s28_s10 }
   0x5   :  { %s2629_s11 = scalar_lea.vmem %s29_s10, 256  ;;  %p2634_p1 = scmp.lt.s32.totalorder %s29_s10, %s29_s10 }
   0x6   :  { %p2630_p0 = scmp.ne.s32.totalorder %s29_s10, %s2629_s11  ;;  %p2635_p2 = scmp.lt.s32.totalorder %s2629_s11, %s2629_s11 }
   0x8   :  { %p2636_p3 = por %p2635_p2, %p2634_p1 }
   0xa   :  { %p2637_p4 = pnand %p2636_p3, %p2630_p0 }
   0xc   :  { %2640 = shalt.err (!%p2637_p4)
}
   0xd   :  { %s2710_s12 = smov 128   ;;  %s2711_s13 = smov 8  }
   0xe   :  { %34 = dma.hbm_to_vmem [thread:$0]  %s3177_s2, 256, %s29_s10, [#allocation4], %s2710_s12, %s2710_s12, %s2711_s13  }
   0xf   :  { %s2712_s16 = smov [#allocation6]  }
  0x10   :  { %s43_s17 = sshll.u32 %s2712_s16, 4  ;;  %s44_s17 = int_to_ptr.vmem [resolvable:$true] %s43_s17 }
  0x11   :  { %s2649_s18 = scalar_lea.vmem %s44_s17, 16  ;;  %s2653_s19 = scalar_lea.vmem %s44_s17, 32 }
  0x12   :  { %p2650_p5 = scmp.ne.s32.totalorder %s44_s17, %s2649_s18  ;;  %p2654_p6 = scmp.lt.s32.totalorder %s44_s17, %s44_s17 }
  0x13   :  { %p2655_p7 = scmp.lt.s32.totalorder %s2653_s19, %s2649_s18 }
  0x15   :  { %p2656_p8 = por %p2655_p7, %p2654_p6 }
  0x17   :  { %p2657_p9 = pnand %p2656_p8, %p2650_p5 }
  0x19   :  { %2660 = shalt.err (!%p2657_p9)
}
  0x1a   :  { %46 = dma.hbm_to_vmem [thread:$0]  %s3179_s4, 16, %s44_s17, [#allocation7]  }
  0x1b   :  { %2701 = dma.done.wait [#allocation4], 256  }
  0x1c   :  { %2702 = vsyncadd [#allocation4], 4294967040 }
  0x1d   :  { %2703 = dma.done.wait [#allocation7], 16  }
  0x1e   :  { %2704 = vsyncadd [#allocation7], 4294967280  ;;  %v2713_v0 = vmov 0   ;;  %vm89_vm0 = vcmask 1041408   ;;  %v59_v1 = vld [vmem:[%s3175_s0] sm:$0xff]  ;;  %v80_v3 = vld [vmem:[%s3176_s1 + $0x28] sm:$0xff]  ;;  %v61_v12 = vlaneseq }
  0x1f   :  { %2492 = vset.pattern.permute.xlu0 %v2713_v0  ;;  %v81_v2 = vld [vmem:[%s3176_s1 + $0x30] sm:$0x3]  ;;  %v60_v4 = vld [vmem:[%s3175_s0 + $0x8] sm:$0xff]  ;;  %v79_v5 = vld [vmem:[%s3176_s1 + $0x20] sm:$0xff]  ;;  %v2714_v11 = vmov 0.0   ;;  %vm82_vm1 = vcmask 408576  }
  0x20   :  { %64 = vperm.xlu0 %2492, %v59_v1   ;;  %2268 = vmatprep.subr.msk.mxu0 %vm89_vm0, %v81_v2  ;;  %v169_v6 = vld [vmem:[#allocation3 + $0x8] sm:$0xff]  ;;  %v77_v8 = vld [vmem:[%s3176_s1 + $0x10] sm:$0xff]  ;;  %v76_v9 = vld [vmem:[%s3176_s1 + $0x8] sm:$0xff]  ;;  %v62_v13 = vand.u32 127, %v61_v12  ;;  %vm2715_vm4 = vmmov 0   ;;  %vm181_vm5 = vcmask 130048  }
  0x21   :  { %2269 = vmatpush3.msk.msra.mxu0 %vm89_vm0, %v81_v2  ;;  %v78_v7 = vld [vmem:[%s3176_s1 + $0x18] sm:$0xff]  ;;  %2285 = vmatprep.subr.mxu1 %v169_v6  ;;  %v75_v10 = vld [vmem:[%s3176_s1] sm:$0xff]  ;;  %v168_v18 = vld [vmem:[#allocation3] sm:$0xff]  ;;  %s2717_s22 = smov 32   ;;  %vm366_vm6 = vcmask 254976   ;;  %vm263_vm7 = vcmask 261120  }
  0x22   :  { %2270 = vmatprep.subr.mxu0 %v80_v3  ;;  %2286 = vmatpush3.msra.mxu1 %v169_v6  ;;  %v2812_v19 = vld [vmem:[%s3178_s3 + $0x18] sm:$0xff]  ;;  %v2819_v20 = vld [vmem:[%s3178_s3 + $0x10] sm:$0xff]  ;;  %v2825_v21 = vld [vmem:[%s3178_s3 + $0x8] sm:$0xff]  ;;  %vm475_vm8 = vcmask 257026   ;;  %vm699_vm9 = vcmask 261126   ;;  %vm587_vm10 = vcmask 259076  }
  0x23   :  { %2271 = vmatpush3.msra.mxu0 %v80_v3  ;;  %2287 = vmatprep.subr.mxu1 %v168_v18  ;;  %v2832_v22 = vld [vmem:[%s3178_s3] sm:$0xff]  ;;  %s2716_s3 = smov 64   ;;  %s2719_s1 = smov [#allocation9]  }
  0x24   :  { %67 = vperm.xlu0 %2492, %v60_v4   ;;  %2272 = vmatprep.subr.mxu0 %v79_v5  ;;  %v2133_v25 = vld [vmem:[#allocation6] ss:$0 sm:$0xff]  ;;  %s2111_s16 = sshll.u32 %s2719_s1, 4  ;;  %s2112_s16 = int_to_ptr.vmem [resolvable:$true] %s2111_s16 }
  0x25   :  { %2273 = vmatpush3.msra.mxu0 %v79_v5  ;;  %2288 = vmatpush3.msra.mxu1 %v168_v18  ;;  %s2661_s17 = scalar_lea.vmem %s2112_s16, 64  ;;  %p2666_p11 = scmp.lt.s32.totalorder %s2112_s16, %s2112_s16 }
  0x26   :  { %2274 = vmatprep.subr.mxu0 %v78_v7  ;;  %2292 = vmatprep.subr.mxu1 %v2714_v11  ;;  %p2662_p10 = scmp.ne.s32.totalorder %s2112_s16, %s2661_s17  ;;  %p2667_p12 = scmp.lt.s32.totalorder %s2661_s17, %s2661_s17 }
  0x27   :  { %2275 = vmatpush3.msra.mxu0 %v78_v7 }
  0x28   :  { %2276 = vmatprep.subr.mxu0 %v77_v8  ;;  %p2668_p13 = por %p2667_p12, %p2666_p11 }
  0x29   :  { %2277 = vmatpush3.msra.mxu0 %v77_v8 }
  0x2a   :  { %2278 = vmatprep.subr.mxu0 %v76_v9  ;;  %p2669_p0 = pnand %p2668_p13, %p2662_p10 }
  0x2b   :  { %2279 = vmatpush3.msra.mxu0 %v76_v9 }
  0x2c   :  { %2280 = vmatprep.subr.mxu0 %v75_v10 }
  0x2d   :  { %2281 = vmatpush3.msra.mxu0 %v75_v10 }
  0x2e   :  { %2314 = vmatprep.subr.mxu0 %v2714_v11 }
  0x9b   :  { %v65_v14 = vpop.permute.xlu0 %64 }
  0x9c   :  { %vm69_vm2 = vcmp.eq.s32.totalorder %v65_v14, %v62_v13 }
  0x9d   :  { %v2128_v15 = vsel %vm69_vm2, 1.0, %v2714_v11 }
  0x9e   :  { %2282 = vmatprep.mubr.msk.f32.mxu0 %vm82_vm1, %v2128_v15 }
  0x9f   :  { %v68_v16 = vpop.permute.xlu0 %67 }
  0xa0   :  { %vm70_vm3 = vcmp.eq.s32.totalorder %v68_v16, %v62_v13 }
  0xa1   :  { %v2129_v17 = vsel %vm70_vm3, 1.0, %v2714_v11 }
  0xa2   :  { %2283 = vmatmul.mubr.msk.f32.vlgmr.msra.gmra.mxu0 %vm82_vm1, %v2129_v17 }
  0xa3   :  { %2315 = vmatpush3.msra.mxu0 %v2812_v19  ;;  %2322 = vmatprep.mubr.msk.f32.mxu0 %vm2715_vm4, %v2714_v11 }
  0xa4   :  { %2316 = vmatprep.subr.mxu0 %v2714_v11 }
  0xa5   :  { %2317 = vmatpush3.msra.mxu0 %v2819_v20 }
  0xa6   :  { %2318 = vmatprep.subr.mxu0 %v2714_v11 }
  0xa7   :  { %2319 = vmatpush3.msra.mxu0 %v2825_v21 }
  0xa8   :  { %2320 = vmatprep.subr.mxu0 %v2714_v11 }
  0xa9   :  { %2321 = vmatpush3.msra.mxu0 %v2832_v22 }
  0xaa   :  { %2336 = vmatprep.subr.mxu0 %v2714_v11 }
 0x162   :  { %v2284_v23 = vpop.f32.mrf.mxu0 }
 0x164   :  { %v159_v24 = vpop.f32.mrf.mxu0 }
 0x165   :  { %2289 = vmatprep.mubr.msk.f32.mxu1 %vm181_vm5, %v159_v24 }
 0x166   :  { %2290 = vmatmul.mubr.msk.f32.vlgmr.msra.gmra.mxu1 %vm181_vm5, %v2284_v23 }
 0x167   :  { %2293 = vmatpush3.msra.mxu1 %v2812_v19  ;;  %2300 = vmatprep.mubr.msk.f32.mxu1 %vm2715_vm4, %v2714_v11 }
 0x168   :  { %2294 = vmatprep.subr.mxu1 %v2714_v11 }
 0x169   :  { %2295 = vmatpush3.msra.mxu1 %v2819_v20 }
 0x16a   :  { %2296 = vmatprep.subr.mxu1 %v2714_v11 }
 0x16b   :  { %2297 = vmatpush3.msra.mxu1 %v2825_v21 }
 0x16c   :  { %2298 = vmatprep.subr.mxu1 %v2714_v11 }
 0x16d   :  { %2299 = vmatpush3.msra.mxu1 %v2832_v22 }
 0x16e   :  { %2301 = vmatmul.mubr.f32.vlgmr.msra.gmra.mxu1 %v2714_v11  ;;  %2303 = vmatprep.subr.mxu1 %v2714_v11 }
 0x16f   :  { %2304 = vmatpush3.msra.mxu1 %v2812_v19  ;;  %2311 = vmatprep.mubr.msk.f32.mxu1 %vm2715_vm4, %v2714_v11 }
 0x170   :  { %2305 = vmatprep.subr.mxu1 %v2714_v11 }
 0x171   :  { %2306 = vmatpush3.msra.mxu1 %v2819_v20 }
 0x172   :  { %2307 = vmatprep.subr.mxu1 %v2714_v11 }
 0x173   :  { %2308 = vmatpush3.msra.mxu1 %v2825_v21 }
 0x174   :  { %2309 = vmatprep.subr.mxu1 %v2714_v11 }
 0x175   :  { %2310 = vmatpush3.msra.mxu1 %v2832_v22 }
 0x176   :  { %2325 = vmatprep.subr.mxu1 %v2714_v11 }
 0x226   :  { %v2291_v26 = vpop.f32.mrf.mxu1 }
 0x227   :  { %v2860_v27 = vadd.f32 %v2291_v26, %v2133_v25 }
 0x228   :  { %v254_v28 = vpop.f32.mrf.mxu1 }
 0x229   :  { %v2862_v29 = vadd.f32 %v2133_v25, %v254_v28 }
 0x22e   :  { %v333_v30 = vpop.f32.mrf.mxu1 }
 0x22f   :  { %v337_v31 = vadd.f32 %v333_v30, %v2862_v29 }
 0x230   :  { %v2302_v32 = vpop.f32.mrf.mxu1 }
 0x231   :  { %2493 = vtanh.f32 %v337_v31  ;;  %v2136_v34 = vmul.f32 -1.442695, %v337_v31 }
 0x233   :  { %2495 = vpow2.f32 %v2136_v34 }
 0x23e   :  { %v2494_v33 = vpop.eup %2493 }
 0x23f   :  { %347 = vrot.lane.b32.xlu1 %v2494_v33, %s2716_s3 }
 0x240   :  { %v2496_v35 = vpop.eup %2495 }
 0x241   :  { %v341_v36 = vadd.f32 1.0, %v2496_v35 }
 0x243   :  { %2497 = vrcp.f32 %v341_v36 }
 0x250   :  { %v2498_v37 = vpop.eup %2497 }
 0x251   :  { %v345_v40 = vmul.f32 0.0, %v2498_v37 }
 0x2b1   :  { %v348_v38 = vpop.permute.xlu1 %347 }
 0x2b2   :  { %v350_v39 = vmul.f32 %v2498_v37, %v348_v38 }
 0x2b4   :  { %352 = vrot.lane.b32.xlu1 %v350_v39, %s2717_s22 }
 0x326   :  { %v353_v41 = vpop.permute.xlu1 %352 }
 0x327   :  { %v355_v42 = vadd.f32 %v353_v41, %v345_v40 }
 0x329   :  { %2499 = vtanh.f32 %v355_v42  ;;  %v452_v58 = vrot.slane %v355_v42, 6 }
 0x336   :  { %v2500_v43 = vpop.eup %2499 }
 0x337   :  { %358 = vrot.lane.b32.xlu0 %v2500_v43, %s2716_s3 }
 0x3a9   :  { %v359_v44 = vpop.permute.xlu0 %358 }
 0x3aa   :  { %v361_v45 = vmul.f32 %v2498_v37, %v359_v44 }
 0x3ac   :  { %363 = vrot.lane.b32.xlu1 %v361_v45, %s2717_s22 }
 0x41e   :  { %v364_v46 = vpop.permute.xlu1 %363 }
 0x41f   :  { %367 = vst.msk [vmem:[#allocation2] sm:$0x3] %vm366_vm6, %v364_v46  ;;  %2312 = vmatmul.mubr.msk.f32.vlgmr.msra.gmra.mxu1 %vm263_vm7, %v364_v46 }
 0x420   :  { %2326 = vmatpush3.msra.mxu1 %v2812_v19  ;;  %2333 = vmatprep.mubr.msk.f32.mxu1 %vm2715_vm4, %v2714_v11 }
 0x421   :  { %2327 = vmatprep.subr.mxu1 %v2714_v11 }
 0x422   :  { %2328 = vmatpush3.msra.mxu1 %v2819_v20 }
 0x423   :  { %2329 = vmatprep.subr.mxu1 %v2714_v11 }
 0x424   :  { %2330 = vmatpush3.msra.mxu1 %v2825_v21 }
 0x425   :  { %2331 = vmatprep.subr.mxu1 %v2714_v11 }
 0x426   :  { %2332 = vmatpush3.msra.mxu1 %v2832_v22 }
 0x427   :  { %2347 = vmatprep.subr.mxu1 %v2714_v11 }
 0x4df   :  { %v436_v47 = vpop.f32.mrf.mxu1 }
 0x4e0   :  { %v441_v48 = vrot.slane %v436_v47, 6 }
 0x4e1   :  { %v2313_v49 = vpop.f32.mrf.mxu1 }
 0x4e2   :  { %v443_v50 = vadd.f32 %v441_v48, %v2862_v29 }
 0x4e4   :  { %2501 = vtanh.f32 %v443_v50  ;;  %v2138_v52 = vmul.f32 -1.442695, %v443_v50 }
 0x4e6   :  { %2503 = vpow2.f32 %v2138_v52 }
 0x4f1   :  { %v2502_v51 = vpop.eup %2501 }
 0x4f2   :  { %456 = vrot.lane.b32.xlu0 %v2502_v51, %s2716_s3 }
 0x4f3   :  { %v2504_v53 = vpop.eup %2503 }
 0x4f4   :  { %v447_v54 = vadd.f32 1.0, %v2504_v53 }
 0x4f6   :  { %2505 = vrcp.f32 %v447_v54 }
 0x503   :  { %v2506_v55 = vpop.eup %2505 }
 0x504   :  { %v454_v59 = vmul.f32 %v2506_v55, %v452_v58 }
 0x564   :  { %v457_v56 = vpop.permute.xlu0 %456 }
 0x565   :  { %v459_v57 = vmul.f32 %v2506_v55, %v457_v56 }
 0x567   :  { %461 = vrot.lane.b32.xlu1 %v459_v57, %s2717_s22 }
 0x5d9   :  { %v462_v60 = vpop.permute.xlu1 %461 }
 0x5da   :  { %v464_v61 = vadd.f32 %v462_v60, %v454_v59 }
 0x5dc   :  { %2507 = vtanh.f32 %v464_v61  ;;  %v564_v15 = vrot.slane %v464_v61, 6 }
 0x5e9   :  { %v2508_v62 = vpop.eup %2507 }
 0x5ea   :  { %467 = vrot.lane.b32.xlu0 %v2508_v62, %s2716_s3 }
 0x65c   :  { %v468_v63 = vpop.permute.xlu0 %467 }
 0x65d   :  { %v2885_v0 = vmul.f32 %v2506_v55, %v468_v63 }
 0x65f   :  { %v477_v1 = vrot.slane %v2885_v0, 2 }
 0x661   :  { %478 = vrot.lane.b32.xlu1 %v477_v1, %s2717_s22 }
 0x6d3   :  { %v479_v2 = vpop.permute.xlu1 %478 }
 0x6d4   :  { %2323 = vmatmul.mubr.msk.f32.vlgmr.msra.gmra.mxu0 %vm263_vm7, %v479_v2 }
 0x6d5   :  { %2337 = vmatpush3.msra.mxu0 %v2812_v19  ;;  %2344 = vmatprep.mubr.msk.f32.mxu0 %vm2715_vm4, %v2714_v11 }
 0x6d6   :  { %2338 = vmatprep.subr.mxu0 %v2714_v11 }
 0x6d7   :  { %2339 = vmatpush3.msra.mxu0 %v2819_v20 }
 0x6d8   :  { %2340 = vmatprep.subr.mxu0 %v2714_v11 }
 0x6d9   :  { %2341 = vmatpush3.msra.mxu0 %v2825_v21 }
 0x6da   :  { %2342 = vmatprep.subr.mxu0 %v2714_v11 }
 0x6db   :  { %2343 = vmatpush3.msra.mxu0 %v2832_v22 }
 0x6dc   :  { %2358 = vmatprep.subr.mxu0 %v2714_v11 }
 0x794   :  { %v548_v3 = vpop.f32.mrf.mxu0 }
 0x795   :  { %v553_v4 = vrot.slane %v548_v3, 4 }
 0x796   :  { %v2324_v5 = vpop.f32.mrf.mxu0 }
 0x797   :  { %v555_v6 = vadd.f32 %v553_v4, %v2862_v29 }
 0x799   :  { %2509 = vtanh.f32 %v555_v6  ;;  %v2140_v8 = vmul.f32 -1.442695, %v555_v6 }
 0x79b   :  { %2511 = vpow2.f32 %v2140_v8 }
 0x7a6   :  { %v2510_v7 = vpop.eup %2509 }
 0x7a7   :  { %568 = vrot.lane.b32.xlu0 %v2510_v7, %s2716_s3 }
 0x7a8   :  { %v2512_v9 = vpop.eup %2511 }
 0x7a9   :  { %v559_v10 = vadd.f32 1.0, %v2512_v9 }
 0x7ab   :  { %2513 = vrcp.f32 %v559_v10 }
 0x7b8   :  { %v2514_v12 = vpop.eup %2513 }
 0x7b9   :  { %v566_v16 = vmul.f32 %v2514_v12, %v564_v15 }
 0x819   :  { %v569_v13 = vpop.permute.xlu0 %568 }
 0x81a   :  { %v571_v14 = vmul.f32 %v2514_v12, %v569_v13 }
 0x81c   :  { %573 = vrot.lane.b32.xlu1 %v571_v14, %s2717_s22 }
 0x88e   :  { %v574_v17 = vpop.permute.xlu1 %573 }
 0x88f   :  { %v576_v18 = vadd.f32 %v574_v17, %v566_v16 }
 0x891   :  { %2515 = vtanh.f32 %v576_v18  ;;  %v676_v41 = vrot.slane %v576_v18, 6 }
 0x89e   :  { %v2516_v23 = vpop.eup %2515 }
 0x89f   :  { %579 = vrot.lane.b32.xlu0 %v2516_v23, %s2716_s3 }
 0x911   :  { %v580_v24 = vpop.permute.xlu0 %579 }
 0x912   :  { %v2904_v25 = vmul.f32 %v2514_v12, %v580_v24 }
 0x914   :  { %v589_v26 = vrot.slane %v2904_v25, 4 }
 0x916   :  { %590 = vrot.lane.b32.xlu1 %v589_v26, %s2717_s22 }
 0x988   :  { %v591_v28 = vpop.permute.xlu1 %590 }
 0x989   :  { %2334 = vmatmul.mubr.msk.f32.vlgmr.msra.gmra.mxu1 %vm263_vm7, %v591_v28 }
 0x98a   :  { %2348 = vmatpush3.msra.mxu1 %v2812_v19  ;;  %2355 = vmatprep.mubr.msk.f32.mxu1 %vm2715_vm4, %v2714_v11 }
 0x98b   :  { %2349 = vmatprep.subr.mxu1 %v2714_v11 }
 0x98c   :  { %2350 = vmatpush3.msra.mxu1 %v2819_v20 }
 0x98d   :  { %2351 = vmatprep.subr.mxu1 %v2714_v11 }
 0x98e   :  { %2352 = vmatpush3.msra.mxu1 %v2825_v21 }
 0x98f   :  { %2353 = vmatprep.subr.mxu1 %v2714_v11 }
 0x990   :  { %2354 = vmatpush3.msra.mxu1 %v2832_v22 }
 0x991   :  { %2369 = vmatprep.subr.mxu1 %v2714_v11 }
 0xa49   :  { %v660_v30 = vpop.f32.mrf.mxu1 }
 0xa4a   :  { %v665_v31 = vrot.slane %v660_v30, 2 }
 0xa4b   :  { %v2335_v32 = vpop.f32.mrf.mxu1 }
 0xa4c   :  { %v667_v33 = vadd.f32 %v665_v31, %v2862_v29 }
 0xa4e   :  { %2517 = vtanh.f32 %v667_v33  ;;  %v2142_v35 = vmul.f32 -1.442695, %v667_v33 }
 0xa50   :  { %2519 = vpow2.f32 %v2142_v35 }
 0xa5b   :  { %v2518_v34 = vpop.eup %2517 }
 0xa5c   :  { %680 = vrot.lane.b32.xlu0 %v2518_v34, %s2716_s3 }
 0xa5d   :  { %v2520_v36 = vpop.eup %2519 }
 0xa5e   :  { %v671_v37 = vadd.f32 1.0, %v2520_v36 }
 0xa60   :  { %2521 = vrcp.f32 %v671_v37 }
 0xa6d   :  { %v2522_v38 = vpop.eup %2521 }
 0xa6e   :  { %v678_v42 = vmul.f32 %v2522_v38, %v676_v41 }
 0xace   :  { %v681_v39 = vpop.permute.xlu0 %680 }
 0xacf   :  { %v683_v40 = vmul.f32 %v2522_v38, %v681_v39 }
 0xad1   :  { %685 = vrot.lane.b32.xlu1 %v683_v40, %s2717_s22 }
 0xb43   :  { %v686_v43 = vpop.permute.xlu1 %685 }
 0xb44   :  { %v688_v44 = vadd.f32 %v686_v43, %v678_v42 }
 0xb46   :  { %2523 = vtanh.f32 %v688_v44  ;;  %v785_v59 = vrot.slane %v688_v44, 6 }
 0xb53   :  { %v2524_v29 = vpop.eup %2523 }
 0xb54   :  { %691 = vrot.lane.b32.xlu0 %v2524_v29, %s2716_s3 }
 0xbc6   :  { %v692_v45 = vpop.permute.xlu0 %691 }
 0xbc7   :  { %v2923_v46 = vmul.f32 %v2522_v38, %v692_v45 }
 0xbc9   :  { %v701_v47 = vrot.slane %v2923_v46, 6 }
 0xbcb   :  { %702 = vrot.lane.b32.xlu1 %v701_v47, %s2717_s22 }
 0xc3d   :  { %v703_v48 = vpop.permute.xlu1 %702 }
 0xc3e   :  { %2345 = vmatmul.mubr.msk.f32.vlgmr.msra.gmra.mxu0 %vm263_vm7, %v703_v48 }
 0xc3f   :  { %2359 = vmatpush3.msra.mxu0 %v2812_v19  ;;  %2366 = vmatprep.mubr.msk.f32.mxu0 %vm2715_vm4, %v2714_v11 }
 0xc40   :  { %2360 = vmatprep.subr.mxu0 %v2714_v11 }
 0xc41   :  { %2361 = vmatpush3.msra.mxu0 %v2819_v20 }
 0xc42   :  { %2362 = vmatprep.subr.mxu0 %v2714_v11 }
 0xc43   :  { %2363 = vmatpush3.msra.mxu0 %v2825_v21 }
 0xc44   :  { %2364 = vmatprep.subr.mxu0 %v2714_v11 }
 0xc45   :  { %2365 = vmatpush3.msra.mxu0 %v2832_v22 }
 0xcfe   :  { %v772_v49 = vpop.f32.mrf.mxu0 }
 0xcff   :  { %v776_v50 = vadd.f32 %v772_v49, %v2860_v27 }
 0xd00   :  { %v2346_v51 = vpop.f32.mrf.mxu0 }
 0xd01   :  { %2525 = vtanh.f32 %v776_v50  ;;  %v2144_v53 = vmul.f32 -1.442695, %v776_v50 }
 0xd03   :  { %2527 = vpow2.f32 %v2144_v53 }
 0xd0e   :  { %v2526_v52 = vpop.eup %2525 }
 0xd0f   :  { %789 = vrot.lane.b32.xlu0 %v2526_v52, %s2716_s3 }
 0xd10   :  { %v2528_v54 = vpop.eup %2527 }
 0xd11   :  { %v780_v55 = vadd.f32 1.0, %v2528_v54 }
 0xd13   :  { %2529 = vrcp.f32 %v780_v55 }
 0xd20   :  { %v2530_v56 = vpop.eup %2529 }
 0xd21   :  { %v787_v60 = vmul.f32 %v2530_v56, %v785_v59 }
 0xd81   :  { %v790_v57 = vpop.permute.xlu0 %789 }
 0xd82   :  { %v792_v58 = vmul.f32 %v2530_v56, %v790_v57 }
 0xd84   :  { %794 = vrot.lane.b32.xlu1 %v792_v58, %s2717_s22 }
 0xdf6   :  { %v795_v61 = vpop.permute.xlu1 %794 }
 0xdf7   :  { %v797_v62 = vadd.f32 %v795_v61, %v787_v60 }
 0xdf9   :  { %2531 = vtanh.f32 %v797_v62 }
 0xe06   :  { %v2532_v63 = vpop.eup %2531 }
 0xe07   :  { %800 = vrot.lane.b32.xlu0 %v2532_v63, %s2716_s3 }
 0xe79   :  { %v801_v1 = vpop.permute.xlu0 %800 }
 0xe7a   :  { %v803_v2 = vmul.f32 %v2530_v56, %v801_v1  ;;  %v1148_v1 = vld [vmem:[%s3180_s5 + $0x18] sm:$0xff] }
 0xe7b   :  { %2380 = vmatprep.subr.mxu0 %v1148_v1 }
 0xe7c   :  { %805 = vrot.lane.b32.xlu1 %v803_v2, %s2717_s22  ;;  %v1147_v2 = vld [vmem:[%s3180_s5 + $0x10] sm:$0xff] }
 0xeee   :  { %v806_v3 = vpop.permute.xlu1 %805 }
 0xeef   :  { %808 = vst.msk [vmem:[#allocation2 + $0x8] sm:$0x3] %vm366_vm6, %v806_v3  ;;  %2356 = vmatmul.mubr.msk.f32.vlgmr.msra.gmra.mxu1 %vm263_vm7, %v806_v3  ;;  %v2999_v3 = vld [vmem:[%s3181_s6 + $0x18] sm:$0xff] }
 0xef0   :  { %2370 = vmatpush3.msra.mxu1 %v2812_v19  ;;  %2377 = vmatprep.mubr.msk.f32.mxu1 %vm2715_vm4, %v2714_v11 }
 0xef1   :  { %2371 = vmatprep.subr.mxu1 %v2714_v11 }
 0xef2   :  { %2372 = vmatpush3.msra.mxu1 %v2819_v20 }
 0xef3   :  { %2373 = vmatprep.subr.mxu1 %v2714_v11 }
 0xef4   :  { %2374 = vmatpush3.msra.mxu1 %v2825_v21 }
 0xef5   :  { %2375 = vmatprep.subr.mxu1 %v2714_v11 }
 0xef6   :  { %2376 = vmatpush3.msra.mxu1 %v2832_v22  ;;  %v893_v22 = vrot.slane %v797_v62, 6 }
 0xef7   :  { %2391 = vmatprep.subr.mxu1 %v2714_v11 }
 0xfaf   :  { %v877_v4 = vpop.f32.mrf.mxu1 }
 0xfb0   :  { %v882_v5 = vrot.slane %v877_v4, 6  ;;  %v3008_v4 = vld [vmem:[%s3181_s6 + $0x10] sm:$0xff] }
 0xfb1   :  { %v2357_v19 = vpop.f32.mrf.mxu1 }
 0xfb2   :  { %v884_v6 = vadd.f32 %v882_v5, %v2860_v27  ;;  %v3014_v5 = vld [vmem:[%s3181_s6 + $0x8] sm:$0xff]  ;;  %v1145_v19 = vld [vmem:[%s3180_s5] sm:$0xff] }
 0xfb4   :  { %2533 = vtanh.f32 %v884_v6  ;;  %v2146_v20 = vmul.f32 -1.442695, %v884_v6  ;;  %v3026_v6 = vld [vmem:[%s3181_s6] sm:$0xff] }
 0xfb6   :  { %2535 = vpow2.f32 %v2146_v20 }
 0xfc1   :  { %v2534_v7 = vpop.eup %2533 }
 0xfc2   :  { %897 = vrot.lane.b32.xlu0 %v2534_v7, %s2716_s3 }
 0xfc3   :  { %v2536_v8 = vpop.eup %2535 }
 0xfc4   :  { %v888_v9 = vadd.f32 1.0, %v2536_v8 }
 0xfc6   :  { %2537 = vrcp.f32 %v888_v9 }
 0xfd3   :  { %v2538_v21 = vpop.eup %2537 }
 0xfd4   :  { %v895_v13 = vmul.f32 %v2538_v21, %v893_v22 }
0x1034   :  { %v898_v10 = vpop.permute.xlu0 %897 }
0x1035   :  { %v900_v12 = vmul.f32 %v2538_v21, %v898_v10 }
0x1037   :  { %902 = vrot.lane.b32.xlu1 %v900_v12, %s2717_s22 }
0x10a9   :  { %v903_v14 = vpop.permute.xlu1 %902 }
0x10aa   :  { %v905_v15 = vadd.f32 %v903_v14, %v895_v13  ;;  %v2151_v14 = vld [vmem:[%s3182_s7] ss:$0 sm:$0xff]  ;;  %s2718_s7 = smov 96  }
0x10ac   :  { %2539 = vtanh.f32 %v905_v15  ;;  %v1004_v39 = vrot.slane %v905_v15, 6 }
0x10b9   :  { %v2540_v16 = vpop.eup %2539 }
0x10ba   :  { %908 = vrot.lane.b32.xlu0 %v2540_v16, %s2716_s3 }
0x112c   :  { %v909_v17 = vpop.permute.xlu0 %908 }
0x112d   :  { %v2958_v18 = vmul.f32 %v2538_v21, %v909_v17 }
0x112f   :  { %v917_v23 = vrot.slane %v2958_v18, 2 }
0x1131   :  { %918 = vrot.lane.b32.xlu1 %v917_v23, %s2717_s22 }
0x11a3   :  { %v919_v24 = vpop.permute.xlu1 %918 }
0x11a4   :  { %2367 = vmatmul.mubr.msk.f32.vlgmr.msra.gmra.mxu0 %vm263_vm7, %v919_v24 }
0x11a5   :  { %2381 = vmatpush3.msra.mxu0 %v1148_v1 }
0x11a6   :  { %2382 = vmatprep.subr.mxu0 %v1147_v2 }
0x11a7   :  { %2383 = vmatpush3.msra.mxu0 %v1147_v2 }
0x1264   :  { %v988_v26 = vpop.f32.mrf.mxu0 }
0x1265   :  { %v993_v28 = vrot.slane %v988_v26, 4 }
0x1266   :  { %v2368_v30 = vpop.f32.mrf.mxu0 }
0x1267   :  { %v995_v31 = vadd.f32 %v993_v28, %v2860_v27 }
0x1269   :  { %2541 = vtanh.f32 %v995_v31  ;;  %v2148_v33 = vmul.f32 -1.442695, %v995_v31 }
0x126b   :  { %2543 = vpow2.f32 %v2148_v33 }
0x1276   :  { %v2542_v32 = vpop.eup %2541 }
0x1277   :  { %1008 = vrot.lane.b32.xlu0 %v2542_v32, %s2716_s3 }
0x1278   :  { %v2544_v34 = vpop.eup %2543 }
0x1279   :  { %v999_v35 = vadd.f32 1.0, %v2544_v34 }
0x127b   :  { %2545 = vrcp.f32 %v999_v35 }
0x1288   :  { %v2546_v36 = vpop.eup %2545 }
0x1289   :  { %v1006_v40 = vmul.f32 %v2546_v36, %v1004_v39 }
0x12e9   :  { %v1009_v37 = vpop.permute.xlu0 %1008 }
0x12ea   :  { %v1011_v38 = vmul.f32 %v2546_v36, %v1009_v37 }
0x12ec   :  { %1013 = vrot.lane.b32.xlu1 %v1011_v38, %s2717_s22 }
0x135e   :  { %v1014_v41 = vpop.permute.xlu1 %1013 }
0x135f   :  { %v1016_v42 = vadd.f32 %v1014_v41, %v1006_v40 }
0x1361   :  { %2547 = vtanh.f32 %v1016_v42 }
0x136e   :  { %v2548_v43 = vpop.eup %2547 }
0x136f   :  { %1019 = vrot.lane.b32.xlu0 %v2548_v43, %s2716_s3 }
0x13e1   :  { %v1020_v44 = vpop.permute.xlu0 %1019 }
0x13e2   :  { %v1022_v29 = vmul.f32 %v2546_v36, %v1020_v44 }
0x13e4   :  { %v1028_v45 = vrot.slane %v1022_v29, 4 }
0x13e6   :  { %1029 = vrot.lane.b32.xlu1 %v1028_v45, %s2717_s22 }
0x1458   :  { %v1030_v47 = vpop.permute.xlu1 %1029 }
0x1459   :  { %2378 = vmatmul.mubr.msk.f32.vlgmr.msra.gmra.mxu1 %vm263_vm7, %v1030_v47 }
0x145a   :  { %2399 = vmatprep.mubr.msk.f32.mxu1 %vm2715_vm4, %v2714_v11  ;;  %2392 = vmatpush3.msra.mxu1 %v2999_v3 }
0x145b   :  { %2393 = vmatprep.subr.mxu1 %v2714_v11 }
0x145c   :  { %2394 = vmatpush3.msra.mxu1 %v3008_v4 }
0x145d   :  { %2395 = vmatprep.subr.mxu1 %v2714_v11 }
0x145e   :  { %2396 = vmatpush3.msra.mxu1 %v3014_v5 }
0x145f   :  { %2397 = vmatprep.subr.mxu1 %v2714_v11 }
0x1460   :  { %2398 = vmatpush3.msra.mxu1 %v3026_v6 }
0x1461   :  { %2400 = vmatmul.mubr.f32.vlgmr.msra.gmra.mxu1 %v2714_v11  ;;  %2413 = vmatprep.subr.mxu1 %v2714_v11 }
0x1462   :  { %2414 = vmatpush3.msra.mxu1 %v2999_v3  ;;  %2421 = vmatprep.mubr.msk.f32.mxu1 %vm2715_vm4, %v2714_v11 }
0x1463   :  { %2415 = vmatprep.subr.mxu1 %v2714_v11 }
0x1464   :  { %2416 = vmatpush3.msra.mxu1 %v3008_v4 }
0x1465   :  { %2417 = vmatprep.subr.mxu1 %v2714_v11 }
0x1466   :  { %2418 = vmatpush3.msra.mxu1 %v3014_v5 }
0x1467   :  { %2419 = vmatprep.subr.mxu1 %v2714_v11 }
0x1468   :  { %2420 = vmatpush3.msra.mxu1 %v3026_v6 }
0x1469   :  { %2435 = vmatprep.subr.mxu1 %v2714_v11 }
0x1519   :  { %v1099_v48 = vpop.f32.mrf.mxu1 }
0x151a   :  { %v1104_v49 = vrot.slane %v1099_v48, 2 }
0x151b   :  { %v2379_v50 = vpop.f32.mrf.mxu1 }
0x151c   :  { %v1106_v51 = vadd.f32 %v1104_v49, %v2860_v27  ;;  %v1115_v27 = vrot.slane %v1016_v42, 6 }
0x151e   :  { %2549 = vtanh.f32 %v1106_v51  ;;  %v2150_v53 = vmul.f32 -1.442695, %v1106_v51 }
0x1520   :  { %2551 = vpow2.f32 %v2150_v53 }
0x1521   :  { %v1309_v22 = vpop.f32.mrf.mxu1 }
0x1523   :  { %v2401_v13 = vpop.f32.mrf.mxu1 }
0x152b   :  { %v2550_v52 = vpop.eup %2549 }
0x152c   :  { %1119 = vrot.lane.b32.xlu0 %v2550_v52, %s2716_s3 }
0x152d   :  { %v2552_v54 = vpop.eup %2551 }
0x152e   :  { %v1110_v55 = vadd.f32 1.0, %v2552_v54 }
0x1530   :  { %2553 = vrcp.f32 %v1110_v55 }
0x153d   :  { %v2554_v56 = vpop.eup %2553 }
0x153e   :  { %v1117_v59 = vmul.f32 %v2554_v56, %v1115_v27 }
0x159e   :  { %v1120_v57 = vpop.permute.xlu0 %1119 }
0x159f   :  { %v1122_v58 = vmul.f32 %v2554_v56, %v1120_v57 }
0x15a1   :  { %1124 = vrot.lane.b32.xlu1 %v1122_v58, %s2717_s22 }
0x15a5   :  { %472 = vrot.lane.b32.xlu1 %v2885_v0, %s2717_s22 }
0x15a9   :  { %696 = vrot.lane.b32.xlu1 %v2923_v46, %s2717_s22 }
0x15ad   :  { %1024 = vrot.lane.b32.xlu1 %v1022_v29, %s2717_s22 }
0x1613   :  { %v1125_v60 = vpop.permute.xlu1 %1124 }
0x1614   :  { %v2979_v61 = vadd.f32 %v1125_v60, %v1117_v59 }
0x1616   :  { %2555 = vtanh.f32 %v2979_v61 }
0x1617   :  { %v473_v62 = vpop.permute.xlu1 %472 }
0x1618   :  { %476 = vst.msk [vmem:[#allocation2] sm:$0xc] %vm475_vm8, %v473_v62 }
0x161b   :  { %v697_v63 = vpop.permute.xlu1 %696 }
0x161c   :  { %700 = vst.msk [vmem:[#allocation2] sm:$0xc0] %vm699_vm9, %v697_v63 }
0x161f   :  { %v1025_v0 = vpop.permute.xlu1 %1024 }
0x1620   :  { %1027 = vst.msk [vmem:[#allocation2 + $0x8] sm:$0x30] %vm587_vm10, %v1025_v0 }
0x1623   :  { %v2556_v46 = vpop.eup %2555 }
0x1624   :  { %1130 = vrot.lane.b32.xlu0 %v2556_v46, %s2716_s3 }
0x1628   :  { %584 = vrot.lane.b32.xlu0 %v2904_v25, %s2717_s22  ;;  %v1146_v25 = vld [vmem:[%s3180_s5 + $0x8] sm:$0xff] }
0x1629   :  { %2384 = vmatprep.subr.mxu0 %v1146_v25 }
0x162a   :  { %2385 = vmatpush3.msra.mxu0 %v1146_v25 }
0x162b   :  { %2386 = vmatprep.subr.mxu0 %v1145_v19 }
0x162c   :  { %913 = vrot.lane.b32.xlu0 %v2958_v18, %s2717_s22  ;;  %2387 = vmatpush3.msra.mxu0 %v1145_v19 }
0x162d   :  { %2402 = vmatprep.subr.mxu0 %v2714_v11 }
0x1696   :  { %v1131_v7 = vpop.permute.xlu0 %1130 }
0x1697   :  { %v1133_v20 = vmul.f32 %v2554_v56, %v1131_v7 }
0x1699   :  { %1135 = vrot.lane.b32.xlu0 %v1133_v20, %s2717_s22 }
0x169a   :  { %v585_v8 = vpop.permute.xlu0 %584 }
0x169b   :  { %588 = vst.msk [vmem:[#allocation2] sm:$0x30] %vm587_vm10, %v585_v8 }
0x169e   :  { %v914_v9 = vpop.permute.xlu0 %913 }
0x169f   :  { %916 = vst.msk [vmem:[#allocation2 + $0x8] sm:$0xc] %vm475_vm8, %v914_v9 }
0x16a2   :  { %v1154_v21 = vld [vmem:[#allocation2] sm:$0xff] }
0x16a3   :  { %2388 = vmatprep.mubr.msk.f32.mxu0 %vm263_vm7, %v1154_v21 }
0x170b   :  { %v1136_v10 = vpop.permute.xlu0 %1135 }
0x170c   :  { %1138 = vst.msk [vmem:[#allocation2 + $0x8] sm:$0xc0] %vm699_vm9, %v1136_v10  ;;  %1139 = vst.msk [vmem:[#allocation8 - $0x6] sm:$0xc0] %vm699_vm9, %v1136_v10 }
0x1713   :  { %v1155_v12 = vld [vmem:[#allocation2 + $0x8] sm:$0xff] }
0x1714   :  { %2389 = vmatmul.mubr.msk.f32.vlgmr.msra.gmra.mxu0 %vm263_vm7, %v1155_v12 }
0x1715   :  { %2403 = vmatpush3.msra.mxu0 %v2999_v3  ;;  %2410 = vmatprep.mubr.msk.f32.mxu0 %vm2715_vm4, %v2714_v11 }
0x1716   :  { %2404 = vmatprep.subr.mxu0 %v2714_v11 }
0x1717   :  { %2405 = vmatpush3.msra.mxu0 %v3008_v4 }
0x1718   :  { %2406 = vmatprep.subr.mxu0 %v2714_v11 }
0x1719   :  { %2407 = vmatpush3.msra.mxu0 %v3014_v5 }
0x171a   :  { %2408 = vmatprep.subr.mxu0 %v2714_v11 }
0x171b   :  { %2409 = vmatpush3.msra.mxu0 %v3026_v6 }
0x171c   :  { %2424 = vmatprep.subr.mxu0 %v2714_v11 }
0x17d4   :  { %v2390_v15 = vpop.f32.mrf.mxu0 }
0x17d5   :  { %v3062_v16 = vadd.f32 %v2390_v15, %v2151_v14 }
0x17d6   :  { %v1234_v17 = vpop.f32.mrf.mxu0 }
0x17d7   :  { %v3064_v18 = vadd.f32 %v2151_v14, %v1234_v17 }
0x17d9   :  { %v1313_v23 = vadd.f32 %v1309_v22, %v3064_v18 }
0x17db   :  { %2557 = vtanh.f32 %v1313_v23  ;;  %v2154_v26 = vmul.f32 -1.442695, %v1313_v23 }
0x17dd   :  { %2559 = vpow2.f32 %v2154_v26 }
0x17e8   :  { %v2558_v24 = vpop.eup %2557 }
0x17e9   :  { %1323 = vrot.lane.b32.xlu1 %v2558_v24, %s2716_s3 }
0x17ea   :  { %v2560_v28 = vpop.eup %2559 }
0x17eb   :  { %v1317_v30 = vadd.f32 1.0, %v2560_v28 }
0x17ed   :  { %2561 = vrcp.f32 %v1317_v30 }
0x17fa   :  { %v2562_v31 = vpop.eup %2561 }
0x17fb   :  { %v1321_v34 = vmul.f32 0.0, %v2562_v31 }
0x185b   :  { %v1324_v32 = vpop.permute.xlu1 %1323 }
0x185c   :  { %v1326_v33 = vmul.f32 %v2562_v31, %v1324_v32 }
0x185e   :  { %1328 = vrot.lane.b32.xlu0 %v1326_v33, %s2717_s22 }
0x18d0   :  { %v1329_v35 = vpop.permute.xlu0 %1328 }
0x18d1   :  { %v1331_v36 = vadd.f32 %v1329_v35, %v1321_v34 }
0x18d3   :  { %2563 = vtanh.f32 %v1331_v36  ;;  %v1425_v52 = vrot.slane %v1331_v36, 6 }
0x18e0   :  { %v2564_v37 = vpop.eup %2563 }
0x18e1   :  { %1334 = vrot.lane.b32.xlu1 %v2564_v37, %s2716_s3 }
0x1953   :  { %v1335_v38 = vpop.permute.xlu1 %1334 }
0x1954   :  { %v1337_v39 = vmul.f32 %v2562_v31, %v1335_v38 }
0x1956   :  { %1339 = vrot.lane.b32.xlu0 %v1337_v39, %s2717_s22 }
0x19c8   :  { %v1340_v40 = vpop.permute.xlu0 %1339 }
0x19c9   :  { %2411 = vmatmul.mubr.msk.f32.vlgmr.msra.gmra.mxu0 %vm263_vm7, %v1340_v40 }
0x19ca   :  { %2425 = vmatpush3.msra.mxu0 %v2999_v3  ;;  %2432 = vmatprep.mubr.msk.f32.mxu0 %vm2715_vm4, %v2714_v11 }
0x19cb   :  { %2426 = vmatprep.subr.mxu0 %v2714_v11 }
0x19cc   :  { %2427 = vmatpush3.msra.mxu0 %v3008_v4 }
0x19cd   :  { %2428 = vmatprep.subr.mxu0 %v2714_v11 }
0x19ce   :  { %2429 = vmatpush3.msra.mxu0 %v3014_v5 }
0x19cf   :  { %2430 = vmatprep.subr.mxu0 %v2714_v11 }
0x19d0   :  { %2431 = vmatpush3.msra.mxu0 %v3026_v6 }
0x19d1   :  { %2446 = vmatprep.subr.mxu0 %v2714_v11 }
0x1a89   :  { %v1409_v41 = vpop.f32.mrf.mxu0 }
0x1a8a   :  { %v1414_v42 = vrot.slane %v1409_v41, 6 }
0x1a8b   :  { %v2412_v43 = vpop.f32.mrf.mxu0 }
0x1a8c   :  { %v1416_v44 = vadd.f32 %v1414_v42, %v3064_v18 }
0x1a8e   :  { %2565 = vtanh.f32 %v1416_v44  ;;  %v2156_v45 = vmul.f32 -1.442695, %v1416_v44 }
0x1a90   :  { %2567 = vpow2.f32 %v2156_v45 }
0x1a9b   :  { %v2566_v29 = vpop.eup %2565 }
0x1a9c   :  { %1429 = vrot.lane.b32.xlu1 %v2566_v29, %s2716_s3 }
0x1a9d   :  { %v2568_v47 = vpop.eup %2567 }
0x1a9e   :  { %v1420_v48 = vadd.f32 1.0, %v2568_v47 }
0x1aa0   :  { %2569 = vrcp.f32 %v1420_v48 }
0x1aad   :  { %v2570_v49 = vpop.eup %2569 }
0x1aae   :  { %v1427_v53 = vmul.f32 %v2570_v49, %v1425_v52 }
0x1b0e   :  { %v1430_v50 = vpop.permute.xlu1 %1429 }
0x1b0f   :  { %v1432_v51 = vmul.f32 %v2570_v49, %v1430_v50 }
0x1b11   :  { %1434 = vrot.lane.b32.xlu0 %v1432_v51, %s2717_s22 }
0x1b83   :  { %v1435_v54 = vpop.permute.xlu0 %1434 }
0x1b84   :  { %v1437_v55 = vadd.f32 %v1435_v54, %v1427_v53 }
0x1b86   :  { %2571 = vtanh.f32 %v1437_v55  ;;  %v1532_v8 = vrot.slane %v1437_v55, 6 }
0x1b93   :  { %v2572_v56 = vpop.eup %2571 }
0x1b94   :  { %1440 = vrot.lane.b32.xlu1 %v2572_v56, %s2716_s3 }
0x1c06   :  { %v1441_v57 = vpop.permute.xlu1 %1440 }
0x1c07   :  { %v1443_v58 = vmul.f32 %v2570_v49, %v1441_v57 }
0x1c09   :  { %v1445_v27 = vrot.slane %v1443_v58, 2 }
0x1c0b   :  { %1446 = vrot.lane.b32.xlu0 %v1445_v27, %s2717_s22 }
0x1c7d   :  { %v1447_v59 = vpop.permute.xlu0 %1446 }
0x1c7e   :  { %2422 = vmatmul.mubr.msk.f32.vlgmr.msra.gmra.mxu1 %vm263_vm7, %v1447_v59 }
0x1c7f   :  { %2436 = vmatpush3.msra.mxu1 %v2999_v3  ;;  %2443 = vmatprep.mubr.msk.f32.mxu1 %vm2715_vm4, %v2714_v11 }
0x1c80   :  { %2437 = vmatprep.subr.mxu1 %v2714_v11 }
0x1c81   :  { %2438 = vmatpush3.msra.mxu1 %v3008_v4 }
0x1c82   :  { %2439 = vmatprep.subr.mxu1 %v2714_v11 }
0x1c83   :  { %2440 = vmatpush3.msra.mxu1 %v3014_v5 }
0x1c84   :  { %2441 = vmatprep.subr.mxu1 %v2714_v11 }
0x1c85   :  { %2442 = vmatpush3.msra.mxu1 %v3026_v6 }
0x1c86   :  { %2457 = vmatprep.subr.mxu1 %v2714_v11 }
0x1d3e   :  { %v1516_v60 = vpop.f32.mrf.mxu1 }
0x1d3f   :  { %v1521_v62 = vrot.slane %v1516_v60, 4 }
0x1d40   :  { %v2423_v63 = vpop.f32.mrf.mxu1 }
0x1d41   :  { %v1523_v0 = vadd.f32 %v1521_v62, %v3064_v18 }
0x1d43   :  { %2573 = vtanh.f32 %v1523_v0  ;;  %v2158_v1 = vmul.f32 -1.442695, %v1523_v0 }
0x1d45   :  { %2575 = vpow2.f32 %v2158_v1 }
0x1d50   :  { %v2574_v46 = vpop.eup %2573 }
0x1d51   :  { %1536 = vrot.lane.b32.xlu1 %v2574_v46, %s2716_s3 }
0x1d52   :  { %v2576_v2 = vpop.eup %2575 }
0x1d53   :  { %v1527_v25 = vadd.f32 1.0, %v2576_v2 }
0x1d55   :  { %2577 = vrcp.f32 %v1527_v25 }
0x1d62   :  { %v2578_v19 = vpop.eup %2577 }
0x1d63   :  { %v1534_v9 = vmul.f32 %v2578_v19, %v1532_v8 }
0x1dc3   :  { %v1537_v7 = vpop.permute.xlu1 %1536 }
0x1dc4   :  { %v1539_v20 = vmul.f32 %v2578_v19, %v1537_v7 }
0x1dc6   :  { %1541 = vrot.lane.b32.xlu0 %v1539_v20, %s2717_s22 }
0x1e38   :  { %v1542_v21 = vpop.permute.xlu0 %1541 }
0x1e39   :  { %v1544_v10 = vadd.f32 %v1542_v21, %v1534_v9 }
0x1e3b   :  { %2579 = vtanh.f32 %v1544_v10  ;;  %v1639_v36 = vrot.slane %v1544_v10, 6 }
0x1e48   :  { %v2580_v12 = vpop.eup %2579 }
0x1e49   :  { %1547 = vrot.lane.b32.xlu1 %v2580_v12, %s2716_s3 }
0x1ebb   :  { %v1548_v22 = vpop.permute.xlu1 %1547 }
0x1ebc   :  { %v1550_v13 = vmul.f32 %v2578_v19, %v1548_v22 }
0x1ebe   :  { %v1552_v14 = vrot.slane %v1550_v13, 4 }
0x1ec0   :  { %1553 = vrot.lane.b32.xlu0 %v1552_v14, %s2717_s22 }
0x1f32   :  { %v1554_v15 = vpop.permute.xlu0 %1553 }
0x1f33   :  { %2433 = vmatmul.mubr.msk.f32.vlgmr.msra.gmra.mxu0 %vm263_vm7, %v1554_v15 }
0x1f34   :  { %2447 = vmatpush3.msra.mxu0 %v2999_v3  ;;  %2454 = vmatprep.mubr.msk.f32.mxu0 %vm2715_vm4, %v2714_v11 }
0x1f35   :  { %2448 = vmatprep.subr.mxu0 %v2714_v11 }
0x1f36   :  { %2449 = vmatpush3.msra.mxu0 %v3008_v4 }
0x1f37   :  { %2450 = vmatprep.subr.mxu0 %v2714_v11 }
0x1f38   :  { %2451 = vmatpush3.msra.mxu0 %v3014_v5 }
0x1f39   :  { %2452 = vmatprep.subr.mxu0 %v2714_v11 }
0x1f3a   :  { %2453 = vmatpush3.msra.mxu0 %v3026_v6 }
0x1f3b   :  { %2468 = vmatprep.subr.mxu0 %v2714_v11 }
0x1ff3   :  { %v1623_v17 = vpop.f32.mrf.mxu0 }
0x1ff4   :  { %v1628_v23 = vrot.slane %v1623_v17, 2 }
0x1ff5   :  { %v2434_v24 = vpop.f32.mrf.mxu0 }
0x1ff6   :  { %v1630_v26 = vadd.f32 %v1628_v23, %v3064_v18 }
0x1ff8   :  { %2581 = vtanh.f32 %v1630_v26  ;;  %v2160_v30 = vmul.f32 -1.442695, %v1630_v26 }
0x1ffa   :  { %2583 = vpow2.f32 %v2160_v30 }
0x2005   :  { %v2582_v28 = vpop.eup %2581 }
0x2006   :  { %1643 = vrot.lane.b32.xlu1 %v2582_v28, %s2716_s3 }
0x2007   :  { %v2584_v31 = vpop.eup %2583 }
0x2008   :  { %v1634_v32 = vadd.f32 1.0, %v2584_v31 }
0x200a   :  { %2585 = vrcp.f32 %v1634_v32 }
0x2017   :  { %v2586_v33 = vpop.eup %2585 }
0x2018   :  { %v1641_v37 = vmul.f32 %v2586_v33, %v1639_v36 }
0x2078   :  { %v1644_v34 = vpop.permute.xlu1 %1643 }
0x2079   :  { %v1646_v35 = vmul.f32 %v2586_v33, %v1644_v34 }
0x207b   :  { %1648 = vrot.lane.b32.xlu0 %v1646_v35, %s2717_s22 }
0x20ed   :  { %v1649_v38 = vpop.permute.xlu0 %1648 }
0x20ee   :  { %v1651_v39 = vadd.f32 %v1649_v38, %v1641_v37 }
0x20f0   :  { %2587 = vtanh.f32 %v1651_v39  ;;  %v1743_v54 = vrot.slane %v1651_v39, 6 }
0x20fd   :  { %v2588_v18 = vpop.eup %2587 }
0x20fe   :  { %1654 = vrot.lane.b32.xlu1 %v2588_v18, %s2716_s3 }
0x2170   :  { %v1655_v40 = vpop.permute.xlu1 %1654 }
0x2171   :  { %v1657_v41 = vmul.f32 %v2586_v33, %v1655_v40 }
0x2173   :  { %v1659_v42 = vrot.slane %v1657_v41, 6 }
0x2175   :  { %1660 = vrot.lane.b32.xlu0 %v1659_v42, %s2717_s22 }
0x21e7   :  { %v1661_v43 = vpop.permute.xlu0 %1660 }
0x21e8   :  { %2444 = vmatmul.mubr.msk.f32.vlgmr.msra.gmra.mxu1 %vm263_vm7, %v1661_v43 }
0x21e9   :  { %2458 = vmatpush3.msra.mxu1 %v2999_v3  ;;  %2465 = vmatprep.mubr.msk.f32.mxu1 %vm2715_vm4, %v2714_v11 }
0x21ea   :  { %2459 = vmatprep.subr.mxu1 %v2714_v11 }
0x21eb   :  { %2460 = vmatpush3.msra.mxu1 %v3008_v4 }
0x21ec   :  { %2461 = vmatprep.subr.mxu1 %v2714_v11 }
0x21ed   :  { %2462 = vmatpush3.msra.mxu1 %v3014_v5 }
0x21ee   :  { %2463 = vmatprep.subr.mxu1 %v2714_v11 }
0x21ef   :  { %2464 = vmatpush3.msra.mxu1 %v3026_v6 }
0x22a8   :  { %v1730_v44 = vpop.f32.mrf.mxu1 }
0x22a9   :  { %v1734_v29 = vadd.f32 %v1730_v44, %v3062_v16 }
0x22aa   :  { %v2445_v45 = vpop.f32.mrf.mxu1 }
0x22ab   :  { %2589 = vtanh.f32 %v1734_v29  ;;  %v2162_v48 = vmul.f32 -1.442695, %v1734_v29 }
0x22ad   :  { %2591 = vpow2.f32 %v2162_v48 }
0x22b8   :  { %v2590_v47 = vpop.eup %2589 }
0x22b9   :  { %1747 = vrot.lane.b32.xlu1 %v2590_v47, %s2716_s3 }
0x22ba   :  { %v2592_v49 = vpop.eup %2591 }
0x22bb   :  { %v1738_v50 = vadd.f32 1.0, %v2592_v49 }
0x22bd   :  { %2593 = vrcp.f32 %v1738_v50 }
0x22ca   :  { %v2594_v51 = vpop.eup %2593 }
0x22cb   :  { %v1745_v55 = vmul.f32 %v2594_v51, %v1743_v54 }
0x232b   :  { %v1748_v52 = vpop.permute.xlu1 %1747 }
0x232c   :  { %v1750_v53 = vmul.f32 %v2594_v51, %v1748_v52 }
0x232e   :  { %1752 = vrot.lane.b32.xlu0 %v1750_v53, %s2717_s22 }
0x23a0   :  { %v1753_v56 = vpop.permute.xlu0 %1752 }
0x23a1   :  { %v1755_v57 = vadd.f32 %v1753_v56, %v1745_v55 }
0x23a3   :  { %2595 = vtanh.f32 %v1755_v57 }
0x23b0   :  { %v2596_v58 = vpop.eup %2595 }
0x23b1   :  { %1758 = vrot.lane.b32.xlu1 %v2596_v58, %s2716_s3 }
0x2423   :  { %v1759_v27 = vpop.permute.xlu1 %1758 }
0x2424   :  { %v1761_v59 = vmul.f32 %v2594_v51, %v1759_v27 }
0x2426   :  { %1763 = vrot.lane.b32.xlu0 %v1761_v59, %s2717_s22 }
0x2498   :  { %v1764_v60 = vpop.permute.xlu0 %1763 }
0x2499   :  { %2455 = vmatmul.mubr.msk.f32.vlgmr.msra.gmra.mxu0 %vm263_vm7, %v1764_v60 }
0x249a   :  { %2469 = vmatpush3.msra.mxu0 %v2999_v3  ;;  %2476 = vmatprep.mubr.msk.f32.mxu0 %vm2715_vm4, %v2714_v11 }
0x249b   :  { %2470 = vmatprep.subr.mxu0 %v2714_v11 }
0x249c   :  { %2471 = vmatpush3.msra.mxu0 %v3008_v4 }
0x249d   :  { %2472 = vmatprep.subr.mxu0 %v2714_v11 }
0x249e   :  { %2473 = vmatpush3.msra.mxu0 %v3014_v5 }
0x249f   :  { %2474 = vmatprep.subr.mxu0 %v2714_v11  ;;  %v1849_v11 = vrot.slane %v1755_v57, 6 }
0x24a0   :  { %2475 = vmatpush3.msra.mxu0 %v3026_v6 }
0x2559   :  { %v1833_v62 = vpop.f32.mrf.mxu0 }
0x255a   :  { %v1838_v63 = vrot.slane %v1833_v62, 6 }
0x255b   :  { %v2456_v0 = vpop.f32.mrf.mxu0 }
0x255c   :  { %v1840_v3 = vadd.f32 %v1838_v63, %v3062_v16 }
0x255e   :  { %2597 = vtanh.f32 %v1840_v3  ;;  %v2164_v1 = vmul.f32 -1.442695, %v1840_v3 }
0x2560   :  { %2599 = vpow2.f32 %v2164_v1 }
0x256b   :  { %v2598_v46 = vpop.eup %2597 }
0x256c   :  { %1853 = vrot.lane.b32.xlu1 %v2598_v46, %s2716_s3 }
0x256d   :  { %v2600_v4 = vpop.eup %2599 }
0x256e   :  { %v1844_v2 = vadd.f32 1.0, %v2600_v4 }
0x2570   :  { %2601 = vrcp.f32 %v1844_v2 }
0x257d   :  { %v2602_v25 = vpop.eup %2601 }
0x257e   :  { %v1851_v6 = vmul.f32 %v2602_v25, %v1849_v11 }
0x25de   :  { %v1854_v5 = vpop.permute.xlu1 %1853 }
0x25df   :  { %v1856_v19 = vmul.f32 %v2602_v25, %v1854_v5 }
0x25e1   :  { %1858 = vrot.lane.b32.xlu0 %v1856_v19, %s2717_s22 }
0x2653   :  { %v1859_v7 = vpop.permute.xlu0 %1858 }
0x2654   :  { %v1861_v20 = vadd.f32 %v1859_v7, %v1851_v6 }
0x2656   :  { %2603 = vtanh.f32 %v1861_v20  ;;  %v1956_v32 = vrot.slane %v1861_v20, 6 }
0x2663   :  { %v2604_v8 = vpop.eup %2603 }
0x2664   :  { %1864 = vrot.lane.b32.xlu1 %v2604_v8, %s2716_s3 }
0x26d6   :  { %v1865_v9 = vpop.permute.xlu1 %1864 }
0x26d7   :  { %v1867_v21 = vmul.f32 %v2602_v25, %v1865_v9 }
0x26d9   :  { %v1869_v10 = vrot.slane %v1867_v21, 2 }
0x26db   :  { %1870 = vrot.lane.b32.xlu0 %v1869_v10, %s2717_s22 }
0x274d   :  { %v1871_v12 = vpop.permute.xlu0 %1870 }
0x274e   :  { %2466 = vmatmul.mubr.msk.f32.vlgmr.msra.gmra.mxu1 %vm263_vm7, %v1871_v12 }
0x280e   :  { %v1940_v22 = vpop.f32.mrf.mxu1 }
0x280f   :  { %v1945_v13 = vrot.slane %v1940_v22, 4 }
0x2810   :  { %v2467_v14 = vpop.f32.mrf.mxu1 }
0x2811   :  { %v1947_v15 = vadd.f32 %v1945_v13, %v3062_v16 }
0x2813   :  { %2605 = vtanh.f32 %v1947_v15  ;;  %v2166_v23 = vmul.f32 -1.442695, %v1947_v15 }
0x2815   :  { %2607 = vpow2.f32 %v2166_v23 }
0x2820   :  { %v2606_v17 = vpop.eup %2605 }
0x2821   :  { %1960 = vrot.lane.b32.xlu1 %v2606_v17, %s2716_s3 }
0x2822   :  { %v2608_v24 = vpop.eup %2607 }
0x2823   :  { %v1951_v26 = vadd.f32 1.0, %v2608_v24 }
0x2825   :  { %2609 = vrcp.f32 %v1951_v26 }
0x2832   :  { %v2610_v28 = vpop.eup %2609 }
0x2833   :  { %v1958_v33 = vmul.f32 %v2610_v28, %v1956_v32 }
0x2893   :  { %v1961_v30 = vpop.permute.xlu1 %1960 }
0x2894   :  { %v1963_v31 = vmul.f32 %v2610_v28, %v1961_v30 }
0x2896   :  { %1965 = vrot.lane.b32.xlu0 %v1963_v31, %s2717_s22 }
0x2908   :  { %v1966_v34 = vpop.permute.xlu0 %1965 }
0x2909   :  { %v1968_v35 = vadd.f32 %v1966_v34, %v1958_v33 }
0x290b   :  { %2611 = vtanh.f32 %v1968_v35  ;;  %v2063_v51 = vrot.slane %v1968_v35, 6 }
0x2918   :  { %v2612_v36 = vpop.eup %2611 }
0x2919   :  { %1971 = vrot.lane.b32.xlu1 %v2612_v36, %s2716_s3 }
0x298b   :  { %v1972_v37 = vpop.permute.xlu1 %1971 }
0x298c   :  { %v1974_v38 = vmul.f32 %v2610_v28, %v1972_v37 }
0x298e   :  { %v1976_v39 = vrot.slane %v1974_v38, 4 }
0x2990   :  { %1977 = vrot.lane.b32.xlu0 %v1976_v39, %s2717_s22 }
0x2a02   :  { %v1978_v18 = vpop.permute.xlu0 %1977 }
0x2a03   :  { %2477 = vmatmul.mubr.msk.f32.vlgmr.msra.gmra.mxu0 %vm263_vm7, %v1978_v18 }
0x2ac3   :  { %v2047_v40 = vpop.f32.mrf.mxu0 }
0x2ac4   :  { %v2052_v41 = vrot.slane %v2047_v40, 2 }
0x2ac5   :  { %v2478_v42 = vpop.f32.mrf.mxu0 }
0x2ac6   :  { %v2054_v43 = vadd.f32 %v2052_v41, %v3062_v16 }
0x2ac8   :  { %2613 = vtanh.f32 %v2054_v43  ;;  %v2168_v29 = vmul.f32 -1.442695, %v2054_v43 }
0x2aca   :  { %2615 = vpow2.f32 %v2168_v29 }
0x2ad5   :  { %v2614_v44 = vpop.eup %2613 }
0x2ad6   :  { %2067 = vrot.lane.b32.xlu1 %v2614_v44, %s2716_s3 }
0x2ad7   :  { %v2616_v45 = vpop.eup %2615 }
0x2ad8   :  { %v2058_v47 = vadd.f32 1.0, %v2616_v45 }
0x2ada   :  { %2617 = vrcp.f32 %v2058_v47 }
0x2ae7   :  { %v2618_v48 = vpop.eup %2617 }
0x2ae8   :  { %v2065_v52 = vmul.f32 %v2618_v48, %v2063_v51 }
0x2b48   :  { %v2068_v49 = vpop.permute.xlu1 %2067 }
0x2b49   :  { %v2070_v50 = vmul.f32 %v2618_v48, %v2068_v49 }
0x2b4b   :  { %2072 = vrot.lane.b32.xlu0 %v2070_v50, %s2717_s22 }
0x2b4f   :  { %1141 = vrot.lane.b32.xlu0 %v2979_v61, %s2718_s7 }
0x2bbd   :  { %v2073_v16 = vpop.permute.xlu0 %2072 }
0x2bbe   :  { %v2075_v53 = vadd.f32 %v2073_v16, %v2065_v52 }
0x2bc0   :  { %2619 = vtanh.f32 %v2075_v53  ;;  %2089 = vrot.lane.b32.xlu0 %v2075_v53, %s2718_s7 }
0x2bc1   :  { %v1142_v54 = vpop.permute.xlu0 %1141 }
0x2bc2   :  { %1144 = vst.msk [vmem:[#allocation9 - $0x6] sm:$0xc0] %vm699_vm9, %v1142_v54 }
0x2bcd   :  { %v2620_v55 = vpop.eup %2619 }
0x2bce   :  { %2078 = vrot.lane.b32.xlu1 %v2620_v55, %s2716_s3 }
0x2c32   :  { %v2090_v56 = vpop.permute.xlu0 %2089 }
0x2c33   :  { %2093 = vst.msk [vmem:[#allocation9 - $0x4] sm:$0xc0] %vm699_vm9, %v2090_v56 }
0x2c34   :  { %2672 = shalt.err (!%p2669_p0)
}
0x2c35   :  { %s2720_s18 = smov 2   ;;  %s2721_s21 = smov [#allocation8]  }
0x2c36   :  { %2117 = dma.vmem_to_hbm [thread:$0]  %s2112_s16, 64, %s3184_s9, [#allocation10], %s2717_s22, %s2717_s22, %s2720_s18  }
0x2c37   :  { %s2099_s2 = sshll.u32 %s2721_s21, 4  ;;  %s2100_s2 = int_to_ptr.vmem [resolvable:$true] %s2099_s2 }
0x2c38   :  { %s2681_s3 = scalar_lea.vmem %s2100_s2, 64  ;;  %p2686_p2 = scmp.lt.s32.totalorder %s2100_s2, %s2100_s2 }
0x2c39   :  { %p2682_p1 = scmp.ne.s32.totalorder %s2100_s2, %s2681_s3  ;;  %p2687_p3 = scmp.lt.s32.totalorder %s2681_s3, %s2681_s3 }
0x2c3b   :  { %p2688_p4 = por %p2687_p3, %p2686_p2 }
0x2c3d   :  { %p2689_p5 = pnand %p2688_p4, %p2682_p1 }
0x2c40   :  { %v2079_v61 = vpop.permute.xlu1 %2078 }
0x2c41   :  { %v2081_v57 = vmul.f32 %v2618_v48, %v2079_v61 }
0x2c43   :  { %2083 = vrot.lane.b32.xlu1 %v2081_v57, %s2717_s22 }
0x2cb5   :  { %v2084_v58 = vpop.permute.xlu1 %2083 }
0x2cb6   :  { %2087 = vst.msk [vmem:[#allocation8 - $0x4] sm:$0xc0] %vm699_vm9, %v2084_v58 }
0x2cb7   :  { %2692 = shalt.err (!%p2689_p5)
}
0x2cb8   :  { %2105 = dma.vmem_to_hbm [thread:$0]  %s2100_s2, 64, %s3183_s8, [#allocation5], %s2717_s22, %s2717_s22, %s2720_s18  }
0x2cb9   :  { %2705 = dma.done.wait [#allocation5], 64  }
0x2cba   :  { %2706 = vsyncadd [#allocation5], 4294967232 }
0x2cbb   :  { %2707 = dma.done.wait [#allocation10], 64  }
0x2cbc   :  { %2708 = vsyncadd [#allocation10], 4294967232 }
0x2cbd   :  { %2124 = vsyncpa [#allocation4], 1 }
0x2cbe   :  { %2125 = vsyncpa [#allocation7], 1 }
0x2cbf   :  { %2126 = vsyncpa [#allocation5], 1 }
0x2cc0   :  { %2127 = vsyncpa [#allocation10], 1 }

</bundles_post_ra>
